<compile_context>
chip_gen: v6e
topology: v6e:2x2x1
jax: 0.10.0
libtpu: 0.0.40
codegen_flags: <defaults>
</compile_context>

<pallas_src>
import functools

import jax
import jax.numpy as jnp
from jax.experimental import pallas as pl
from jax.experimental.pallas import tpu as pltpu


# ----------------------------------------------------------------------------
# Fused Pallas kernel: num_layers x LSTM  ->  ReLU -> fc1 -> ReLU -> fc2
# ----------------------------------------------------------------------------
def _fused_lstm_kernel(*refs, num_layers, T, B, H):
    # Ref layout: [x, (wih_l, whh_l, b_l) * num_layers, w1, b1, w2, b2, out]
    x_ref = refs[0]
    pos = 1
    layer_refs = []
    for _ in range(num_layers):
        layer_refs.append(tuple(refs[pos:pos + 3]))
        pos += 3
    w1_ref, b1_ref, w2_ref, b2_ref = refs[pos:pos + 4]
    o_ref = refs[pos + 4]

    # Load every weight once; the fully-unrolled body reuses the values.
    wih = [layer_refs[l][0][...] for l in range(num_layers)]    # (in_f, 4H) bf16
    whh = [layer_refs[l][1][...] for l in range(num_layers)]    # (H, 4H)    bf16
    bias = [layer_refs[l][2][...] for l in range(num_layers)]   # (1, 4H)    f32

    # ---- hoisted layer-0 input projection: one MXU matmul for the whole
    # sequence, bias folded in.  (B,T,I)->(B*T,I) and (B*T,4H)->(B,T,4H) are
    # layout-preserving leading-dim reshapes.
    x2d = x_ref[...].reshape(B * T, x_ref.shape[-1]).astype(jnp.bfloat16)
    xw0 = jnp.dot(x2d, wih[0], preferred_element_type=jnp.float32)
    xw0 = xw0.reshape(B, T, 4 * H) + bias[0]                    # (B, T, 4H) f32

    h = [jnp.zeros((B, H), jnp.float32) for _ in range(num_layers)]
    c = [jnp.zeros((B, H), jnp.float32) for _ in range(num_layers)]

    def lstm_cell(gates, c_prev):
        # Full-lane-width activation: 2 EUP dispatches over (B, 4H); the
        # i/f/g/o quadrants are then cheap static lane slices (VPU only).
        sg = jax.nn.sigmoid(gates)
        th = jnp.tanh(gates)
        i_g = sg[:, 0 * H:1 * H]
        f_g = sg[:, 1 * H:2 * H]
        g_g = th[:, 2 * H:3 * H]
        o_g = sg[:, 3 * H:4 * H]
        c_new = f_g * c_prev + i_g * g_g
        h_new = o_g * jnp.tanh(c_new)
        return h_new, c_new

    # ---- wavefront recurrence: t outer, l inner (fully unrolled; T static).
    for t in range(T):
        for l in range(num_layers):
            rec = jnp.dot(h[l].astype(jnp.bfloat16), whh[l],
                          preferred_element_type=jnp.float32)
            if l == 0:
                gates = xw0[:, t, :] + rec
            else:
                inp = jnp.dot(h[l - 1].astype(jnp.bfloat16), wih[l],
                              preferred_element_type=jnp.float32)
                gates = inp + rec + bias[l]
            h[l], c[l] = lstm_cell(gates, c[l])

    # ---- head: relu(h_last) -> fc1 -> relu -> fc2
    hr = jnp.maximum(h[-1], 0.0)
    z = jnp.maximum(
        jnp.dot(hr.astype(jnp.bfloat16), w1_ref[...],
                preferred_element_type=jnp.float32) + b1_ref[...], 0.0)
    out = (jnp.dot(z.astype(jnp.bfloat16), w2_ref[...],
                   preferred_element_type=jnp.float32) + b2_ref[...])
    o_ref[...] = out.astype(o_ref.dtype)


# ----------------------------------------------------------------------------
# Wrappers
# ----------------------------------------------------------------------------
def prepare_params(params, num_layers):
    """One-time conversion of PyTorch-layout params to kernel layout.

    Weights are transposed and cast to bf16 (MXU-native); biases stay f32 and
    the two LSTM biases are pre-summed.
    """
    kp = {}
    for l in range(num_layers):
        kp[f"wih_{l}"] = jnp.transpose(params[f"w_ih_{l}"]).astype(jnp.bfloat16)
        kp[f"whh_{l}"] = jnp.transpose(params[f"w_hh_{l}"]).astype(jnp.bfloat16)
        kp[f"b_{l}"] = (params[f"b_ih_{l}"] + params[f"b_hh_{l}"]
                        ).reshape(1, -1).astype(jnp.float32)
    kp["fc1_w"] = jnp.transpose(params["fc1_w"]).astype(jnp.bfloat16)  # (H, 128)
    kp["fc1_b"] = params["fc1_b"].reshape(1, -1).astype(jnp.float32)
    kp["fc2_w"] = jnp.transpose(params["fc2_w"]).astype(jnp.bfloat16)  # (128, C)
    kp["fc2_b"] = params["fc2_b"].reshape(1, -1).astype(jnp.float32)
    return kp


@functools.partial(jax.jit, static_argnames=("num_layers",))
def lstm_model_forward(x, kparams, *, num_layers):
    """x: (B, T, input_size), batch_first — same as the PyTorch module."""
    B, T, _ = x.shape
    H = kparams["whh_0"].shape[0]
    C = kparams["fc2_w"].shape[1]

    inputs = [x.astype(jnp.float32)]
    for l in range(num_layers):
        inputs += [kparams[f"wih_{l}"], kparams[f"whh_{l}"], kparams[f"b_{l}"]]
    inputs += [kparams["fc1_w"], kparams["fc1_b"],
               kparams["fc2_w"], kparams["fc2_b"]]

    kernel = functools.partial(_fused_lstm_kernel,
                               num_layers=num_layers, T=T, B=B, H=H)
    return pl.pallas_call(
        kernel,
        out_shape=jax.ShapeDtypeStruct((B, C), jnp.float32),
        in_specs=[pl.BlockSpec(memory_space=pltpu.MemorySpace.VMEM)]
        * len(inputs),
        out_specs=pl.BlockSpec(memory_space=pltpu.MemorySpace.VMEM),
    )(*inputs)


# ----------------------------------------------------------------------------
# Pure-JAX reference (for a self-check) and parameter construction
# ----------------------------------------------------------------------------
def _reference_forward(x, params, num_layers):
    B, T, _ = x.shape
    H = params["w_hh_0"].shape[1]
    hp = jax.lax.Precision.HIGHEST
    inp = x
    h = jnp.zeros((B, H), jnp.float32)
    for l in range(num_layers):
        w_ih = params[f"w_ih_{l}"]
        w_hh = params[f"w_hh_{l}"]
        b = params[f"b_ih_{l}"] + params[f"b_hh_{l}"]
        h = jnp.zeros((B, H), jnp.float32)
        c = jnp.zeros((B, H), jnp.float32)
        ys = []
        for t in range(T):
            g = (jnp.dot(inp[:, t, :], w_ih.T, precision=hp)
                 + jnp.dot(h, w_hh.T, precision=hp) + b)
            i = jax.nn.sigmoid(g[:, 0 * H:1 * H])
            f = jax.nn.sigmoid(g[:, 1 * H:2 * H])
            gg = jnp.tanh(g[:, 2 * H:3 * H])
            o = jax.nn.sigmoid(g[:, 3 * H:4 * H])
            c = f * c + i * gg
            h = o * jnp.tanh(c)
            ys.append(h)
        inp = jnp.stack(ys, axis=1)
    out = jnp.maximum(h, 0.0)
    out = jnp.maximum(jnp.dot(out, params["fc1_w"].T, precision=hp)
                      + params["fc1_b"], 0.0)
    return jnp.dot(out, params["fc2_w"].T, precision=hp) + params["fc2_b"]


def init_params(key, num_classes, input_size, hidden_size, num_layers):
    params = {}
    k = 1.0 / jnp.sqrt(hidden_size)
    for l in range(num_layers):
        in_f = input_size if l == 0 else hidden_size
        key, k1, k2, k3, k4 = jax.random.split(key, 5)
        params[f"w_ih_{l}"] = jax.random.uniform(
            k1, (4 * hidden_size, in_f), jnp.float32, -k, k)
        params[f"w_hh_{l}"] = jax.random.uniform(
            k2, (4 * hidden_size, hidden_size), jnp.float32, -k, k)
        params[f"b_ih_{l}"] = jax.random.uniform(
            k3, (4 * hidden_size,), jnp.float32, -k, k)
        params[f"b_hh_{l}"] = jax.random.uniform(
            k4, (4 * hidden_size,), jnp.float32, -k, k)

    key, k1, k2, k3, k4 = jax.random.split(key, 5)
    kf1 = 1.0 / jnp.sqrt(hidden_size)
    params["fc1_w"] = jax.random.uniform(k1, (128, hidden_size), jnp.float32, -kf1, kf1)
    params["fc1_b"] = jax.random.uniform(k2, (128,), jnp.float32, -kf1, kf1)
    kf2 = 1.0 / jnp.sqrt(128.0)
    params["fc2_w"] = jax.random.uniform(k3, (num_classes, 128), jnp.float32, -kf2, kf2)
    params["fc2_b"] = jax.random.uniform(k4, (num_classes,), jnp.float32, -kf2, kf2)
    return params


# ----------------------------------------------------------------------------
if __name__ == "__main__":
    num_classes = 5
    input_size = 4
    hidden_size = 32
    num_layers = 2
    batch = 2
    seq = 8

    key = jax.random.PRNGKey(0)
    key, pkey, xkey = jax.random.split(key, 3)
    params = init_params(pkey, num_classes, input_size, hidden_size, num_layers)
    kparams = prepare_params(params, num_layers)

    x = jax.random.normal(xkey, (batch, seq, input_size), jnp.float32)

    out = lstm_model_forward(x, kparams, num_layers=num_layers)
    out = jax.block_until_ready(out)
    assert out.shape == (batch, num_classes), out.shape
    assert bool(jnp.all(jnp.isfinite(out)))

    ref = _reference_forward(x, params, num_layers)
    max_err = float(jnp.max(jnp.abs(out - ref)))
    # bf16 matmul operands with f32 accumulation -> small deviation vs the
    # f32 reference; 3e-2 comfortably covers it at these sizes.
    assert bool(jnp.allclose(out, ref, atol=3e-2, rtol=3e-2)), (
        "kernel/reference mismatch", max_err, out, ref)

    print("KERNEL_OK")
</pallas_src>

<mosaic_0001>
module attributes {stable_mosaic.version = 11 : i64} {
  func.func @_fused_lstm_kernel(%arg0: memref<2x8x4xf32, #tpu.memory_space<vmem>>, %arg1: memref<4x128xbf16, #tpu.memory_space<vmem>>, %arg2: memref<32x128xbf16, #tpu.memory_space<vmem>>, %arg3: memref<1x128xf32, #tpu.memory_space<vmem>>, %arg4: memref<32x128xbf16, #tpu.memory_space<vmem>>, %arg5: memref<32x128xbf16, #tpu.memory_space<vmem>>, %arg6: memref<1x128xf32, #tpu.memory_space<vmem>>, %arg7: memref<32x128xbf16, #tpu.memory_space<vmem>>, %arg8: memref<1x128xf32, #tpu.memory_space<vmem>>, %arg9: memref<128x5xbf16, #tpu.memory_space<vmem>>, %arg10: memref<1x5xf32, #tpu.memory_space<vmem>>, %arg11: memref<2x5xf32, #tpu.memory_space<vmem>>) attributes {dimension_semantics = [], scalar_prefetch = 0 : i64, scratch_operands = 0 : i64, tpu.core_type = #tpu.core_type<tc>} {
    %c0 = arith.constant 0 : index
    %c0_0 = arith.constant 0 : index
    %0 = vector.load %arg1[%c0, %c0_0] : memref<4x128xbf16, #tpu.memory_space<vmem>>, vector<4x128xbf16>
    %c0_1 = arith.constant 0 : index
    %c0_2 = arith.constant 0 : index
    %1 = vector.load %arg4[%c0_1, %c0_2] : memref<32x128xbf16, #tpu.memory_space<vmem>>, vector<32x128xbf16>
    %c0_3 = arith.constant 0 : index
    %c0_4 = arith.constant 0 : index
    %2 = vector.load %arg2[%c0_3, %c0_4] : memref<32x128xbf16, #tpu.memory_space<vmem>>, vector<32x128xbf16>
    %c0_5 = arith.constant 0 : index
    %c0_6 = arith.constant 0 : index
    %3 = vector.load %arg5[%c0_5, %c0_6] : memref<32x128xbf16, #tpu.memory_space<vmem>>, vector<32x128xbf16>
    %c0_7 = arith.constant 0 : index
    %c0_8 = arith.constant 0 : index
    %4 = vector.load %arg3[%c0_7, %c0_8] : memref<1x128xf32, #tpu.memory_space<vmem>>, vector<1x128xf32>
    %c0_9 = arith.constant 0 : index
    %c0_10 = arith.constant 0 : index
    %5 = vector.load %arg6[%c0_9, %c0_10] : memref<1x128xf32, #tpu.memory_space<vmem>>, vector<1x128xf32>
    %c0_11 = arith.constant 0 : index
    %c0_12 = arith.constant 0 : index
    %c0_13 = arith.constant 0 : index
    %6 = vector.load %arg0[%c0_11, %c0_12, %c0_13] : memref<2x8x4xf32, #tpu.memory_space<vmem>>, vector<2x8x4xf32>
    %7 = vector.shape_cast %6 : vector<2x8x4xf32> to vector<16x4xf32>
    %8 = arith.truncf %7 : vector<16x4xf32> to vector<16x4xbf16>
    %cst = arith.constant dense<0.000000e+00> : vector<16x128xf32>
    %9 = tpu.matmul %8, %0, %cst {dimension_numbers = #tpu.dot_dimension_numbers<[1], [0], [0], [1], [0, 0, 1, 1], [], []>} : vector<16x4xbf16>, vector<4x128xbf16>, vector<16x128xf32> -> vector<16x128xf32>
    %10 = vector.shape_cast %9 : vector<16x128xf32> to vector<2x8x128xf32>
    %11 = vector.shape_cast %4 : vector<1x128xf32> to vector<1x1x128xf32>
    %12 = vector.broadcast %11 : vector<1x1x128xf32> to vector<2x8x128xf32>
    %13 = arith.addf %10, %12 : vector<2x8x128xf32>
    %cst_14 = arith.constant 0.000000e+00 : f32
    %14 = vector.broadcast %cst_14 : f32 to vector<2x32xf32>
    %cst_15 = arith.constant 0.000000e+00 : f32
    %15 = vector.broadcast %cst_15 : f32 to vector<2x32xf32>
    %cst_16 = arith.constant 0.000000e+00 : f32
    %16 = vector.broadcast %cst_16 : f32 to vector<2x32xf32>
    %cst_17 = arith.constant 0.000000e+00 : f32
    %17 = vector.broadcast %cst_17 : f32 to vector<2x32xf32>
    %18 = arith.truncf %14 : vector<2x32xf32> to vector<2x32xbf16>
    %cst_18 = arith.constant dense<0.000000e+00> : vector<2x128xf32>
    %19 = tpu.matmul %18, %2, %cst_18 {dimension_numbers = #tpu.dot_dimension_numbers<[1], [0], [0], [1], [0, 0, 1, 1], [], []>} : vector<2x32xbf16>, vector<32x128xbf16>, vector<2x128xf32> -> vector<2x128xf32>
    %20 = vector.extract_strided_slice %13 {offsets = [0, 0, 0], sizes = [2, 1, 128], strides = [1, 1, 1]} : vector<2x8x128xf32> to vector<2x1x128xf32>
    %21 = vector.shape_cast %20 : vector<2x1x128xf32> to vector<2x128xf32>
    %22 = arith.addf %21, %19 : vector<2x128xf32>
    %23 = arith.negf %22 : vector<2x128xf32>
    %24 = math.exp %23 : vector<2x128xf32>
    %cst_19 = arith.constant 1.000000e+00 : f32
    %25 = vector.broadcast %cst_19 : f32 to vector<2x128xf32>
    %26 = arith.addf %25, %24 : vector<2x128xf32>
    %27 = arith.divf %25, %26 : vector<2x128xf32>
    %28 = math.tanh %22 : vector<2x128xf32>
    %29 = vector.extract_strided_slice %27 {offsets = [0, 0], sizes = [2, 32], strides = [1, 1]} : vector<2x128xf32> to vector<2x32xf32>
    %30 = vector.extract_strided_slice %27 {offsets = [0, 32], sizes = [2, 32], strides = [1, 1]} : vector<2x128xf32> to vector<2x32xf32>
    %31 = vector.extract_strided_slice %28 {offsets = [0, 64], sizes = [2, 32], strides = [1, 1]} : vector<2x128xf32> to vector<2x32xf32>
    %32 = vector.extract_strided_slice %27 {offsets = [0, 96], sizes = [2, 32], strides = [1, 1]} : vector<2x128xf32> to vector<2x32xf32>
    %33 = arith.mulf %30, %16 : vector<2x32xf32>
    %34 = arith.mulf %29, %31 : vector<2x32xf32>
    %35 = arith.addf %33, %34 : vector<2x32xf32>
    %36 = math.tanh %35 : vector<2x32xf32>
    %37 = arith.mulf %32, %36 : vector<2x32xf32>
    %38 = arith.truncf %15 : vector<2x32xf32> to vector<2x32xbf16>
    %cst_20 = arith.constant dense<0.000000e+00> : vector<2x128xf32>
    %39 = tpu.matmul %38, %3, %cst_20 {dimension_numbers = #tpu.dot_dimension_numbers<[1], [0], [0], [1], [0, 0, 1, 1], [], []>} : vector<2x32xbf16>, vector<32x128xbf16>, vector<2x128xf32> -> vector<2x128xf32>
    %40 = arith.truncf %37 : vector<2x32xf32> to vector<2x32xbf16>
    %cst_21 = arith.constant dense<0.000000e+00> : vector<2x128xf32>
    %41 = tpu.matmul %40, %1, %cst_21 {dimension_numbers = #tpu.dot_dimension_numbers<[1], [0], [0], [1], [0, 0, 1, 1], [], []>} : vector<2x32xbf16>, vector<32x128xbf16>, vector<2x128xf32> -> vector<2x128xf32>
    %42 = arith.addf %41, %39 : vector<2x128xf32>
    %43 = vector.broadcast %5 : vector<1x128xf32> to vector<2x128xf32>
    %44 = arith.addf %42, %43 : vector<2x128xf32>
    %45 = arith.negf %44 : vector<2x128xf32>
    %46 = math.exp %45 : vector<2x128xf32>
    %cst_22 = arith.constant 1.000000e+00 : f32
    %47 = vector.broadcast %cst_22 : f32 to vector<2x128xf32>
    %48 = arith.addf %47, %46 : vector<2x128xf32>
    %49 = arith.divf %47, %48 : vector<2x128xf32>
    %50 = math.tanh %44 : vector<2x128xf32>
    %51 = vector.extract_strided_slice %49 {offsets = [0, 0], sizes = [2, 32], strides = [1, 1]} : vector<2x128xf32> to vector<2x32xf32>
    %52 = vector.extract_strided_slice %49 {offsets = [0, 32], sizes = [2, 32], strides = [1, 1]} : vector<2x128xf32> to vector<2x32xf32>
    %53 = vector.extract_strided_slice %50 {offsets = [0, 64], sizes = [2, 32], strides = [1, 1]} : vector<2x128xf32> to vector<2x32xf32>
    %54 = vector.extract_strided_slice %49 {offsets = [0, 96], sizes = [2, 32], strides = [1, 1]} : vector<2x128xf32> to vector<2x32xf32>
    %55 = arith.mulf %52, %17 : vector<2x32xf32>
    %56 = arith.mulf %51, %53 : vector<2x32xf32>
    %57 = arith.addf %55, %56 : vector<2x32xf32>
    %58 = math.tanh %57 : vector<2x32xf32>
    %59 = arith.mulf %54, %58 : vector<2x32xf32>
    %60 = arith.truncf %37 : vector<2x32xf32> to vector<2x32xbf16>
    %cst_23 = arith.constant dense<0.000000e+00> : vector<2x128xf32>
    %61 = tpu.matmul %60, %2, %cst_23 {dimension_numbers = #tpu.dot_dimension_numbers<[1], [0], [0], [1], [0, 0, 1, 1], [], []>} : vector<2x32xbf16>, vector<32x128xbf16>, vector<2x128xf32> -> vector<2x128xf32>
    %62 = vector.extract_strided_slice %13 {offsets = [0, 1, 0], sizes = [2, 1, 128], strides = [1, 1, 1]} : vector<2x8x128xf32> to vector<2x1x128xf32>
    %63 = vector.shape_cast %62 : vector<2x1x128xf32> to vector<2x128xf32>
    %64 = arith.addf %63, %61 : vector<2x128xf32>
    %65 = arith.negf %64 : vector<2x128xf32>
    %66 = math.exp %65 : vector<2x128xf32>
    %cst_24 = arith.constant 1.000000e+00 : f32
    %67 = vector.broadcast %cst_24 : f32 to vector<2x128xf32>
    %68 = arith.addf %67, %66 : vector<2x128xf32>
    %69 = arith.divf %67, %68 : vector<2x128xf32>
    %70 = math.tanh %64 : vector<2x128xf32>
    %71 = vector.extract_strided_slice %69 {offsets = [0, 0], sizes = [2, 32], strides = [1, 1]} : vector<2x128xf32> to vector<2x32xf32>
    %72 = vector.extract_strided_slice %69 {offsets = [0, 32], sizes = [2, 32], strides = [1, 1]} : vector<2x128xf32> to vector<2x32xf32>
    %73 = vector.extract_strided_slice %70 {offsets = [0, 64], sizes = [2, 32], strides = [1, 1]} : vector<2x128xf32> to vector<2x32xf32>
    %74 = vector.extract_strided_slice %69 {offsets = [0, 96], sizes = [2, 32], strides = [1, 1]} : vector<2x128xf32> to vector<2x32xf32>
    %75 = arith.mulf %72, %35 : vector<2x32xf32>
    %76 = arith.mulf %71, %73 : vector<2x32xf32>
    %77 = arith.addf %75, %76 : vector<2x32xf32>
    %78 = math.tanh %77 : vector<2x32xf32>
    %79 = arith.mulf %74, %78 : vector<2x32xf32>
    %80 = arith.truncf %59 : vector<2x32xf32> to vector<2x32xbf16>
    %cst_25 = arith.constant dense<0.000000e+00> : vector<2x128xf32>
    %81 = tpu.matmul %80, %3, %cst_25 {dimension_numbers = #tpu.dot_dimension_numbers<[1], [0], [0], [1], [0, 0, 1, 1], [], []>} : vector<2x32xbf16>, vector<32x128xbf16>, vector<2x128xf32> -> vector<2x128xf32>
    %82 = arith.truncf %79 : vector<2x32xf32> to vector<2x32xbf16>
    %cst_26 = arith.constant dense<0.000000e+00> : vector<2x128xf32>
    %83 = tpu.matmul %82, %1, %cst_26 {dimension_numbers = #tpu.dot_dimension_numbers<[1], [0], [0], [1], [0, 0, 1, 1], [], []>} : vector<2x32xbf16>, vector<32x128xbf16>, vector<2x128xf32> -> vector<2x128xf32>
    %84 = arith.addf %83, %81 : vector<2x128xf32>
    %85 = vector.broadcast %5 : vector<1x128xf32> to vector<2x128xf32>
    %86 = arith.addf %84, %85 : vector<2x128xf32>
    %87 = arith.negf %86 : vector<2x128xf32>
    %88 = math.exp %87 : vector<2x128xf32>
    %cst_27 = arith.constant 1.000000e+00 : f32
    %89 = vector.broadcast %cst_27 : f32 to vector<2x128xf32>
    %90 = arith.addf %89, %88 : vector<2x128xf32>
    %91 = arith.divf %89, %90 : vector<2x128xf32>
    %92 = math.tanh %86 : vector<2x128xf32>
    %93 = vector.extract_strided_slice %91 {offsets = [0, 0], sizes = [2, 32], strides = [1, 1]} : vector<2x128xf32> to vector<2x32xf32>
    %94 = vector.extract_strided_slice %91 {offsets = [0, 32], sizes = [2, 32], strides = [1, 1]} : vector<2x128xf32> to vector<2x32xf32>
    %95 = vector.extract_strided_slice %92 {offsets = [0, 64], sizes = [2, 32], strides = [1, 1]} : vector<2x128xf32> to vector<2x32xf32>
    %96 = vector.extract_strided_slice %91 {offsets = [0, 96], sizes = [2, 32], strides = [1, 1]} : vector<2x128xf32> to vector<2x32xf32>
    %97 = arith.mulf %94, %57 : vector<2x32xf32>
    %98 = arith.mulf %93, %95 : vector<2x32xf32>
    %99 = arith.addf %97, %98 : vector<2x32xf32>
    %100 = math.tanh %99 : vector<2x32xf32>
    %101 = arith.mulf %96, %100 : vector<2x32xf32>
    %102 = arith.truncf %79 : vector<2x32xf32> to vector<2x32xbf16>
    %cst_28 = arith.constant dense<0.000000e+00> : vector<2x128xf32>
    %103 = tpu.matmul %102, %2, %cst_28 {dimension_numbers = #tpu.dot_dimension_numbers<[1], [0], [0], [1], [0, 0, 1, 1], [], []>} : vector<2x32xbf16>, vector<32x128xbf16>, vector<2x128xf32> -> vector<2x128xf32>
    %104 = vector.extract_strided_slice %13 {offsets = [0, 2, 0], sizes = [2, 1, 128], strides = [1, 1, 1]} : vector<2x8x128xf32> to vector<2x1x128xf32>
    %105 = vector.shape_cast %104 : vector<2x1x128xf32> to vector<2x128xf32>
    %106 = arith.addf %105, %103 : vector<2x128xf32>
    %107 = arith.negf %106 : vector<2x128xf32>
    %108 = math.exp %107 : vector<2x128xf32>
    %cst_29 = arith.constant 1.000000e+00 : f32
    %109 = vector.broadcast %cst_29 : f32 to vector<2x128xf32>
    %110 = arith.addf %109, %108 : vector<2x128xf32>
    %111 = arith.divf %109, %110 : vector<2x128xf32>
    %112 = math.tanh %106 : vector<2x128xf32>
    %113 = vector.extract_strided_slice %111 {offsets = [0, 0], sizes = [2, 32], strides = [1, 1]} : vector<2x128xf32> to vector<2x32xf32>
    %114 = vector.extract_strided_slice %111 {offsets = [0, 32], sizes = [2, 32], strides = [1, 1]} : vector<2x128xf32> to vector<2x32xf32>
    %115 = vector.extract_strided_slice %112 {offsets = [0, 64], sizes = [2, 32], strides = [1, 1]} : vector<2x128xf32> to vector<2x32xf32>
    %116 = vector.extract_strided_slice %111 {offsets = [0, 96], sizes = [2, 32], strides = [1, 1]} : vector<2x128xf32> to vector<2x32xf32>
    %117 = arith.mulf %114, %77 : vector<2x32xf32>
    %118 = arith.mulf %113, %115 : vector<2x32xf32>
    %119 = arith.addf %117, %118 : vector<2x32xf32>
    %120 = math.tanh %119 : vector<2x32xf32>
    %121 = arith.mulf %116, %120 : vector<2x32xf32>
    %122 = arith.truncf %101 : vector<2x32xf32> to vector<2x32xbf16>
    %cst_30 = arith.constant dense<0.000000e+00> : vector<2x128xf32>
    %123 = tpu.matmul %122, %3, %cst_30 {dimension_numbers = #tpu.dot_dimension_numbers<[1], [0], [0], [1], [0, 0, 1, 1], [], []>} : vector<2x32xbf16>, vector<32x128xbf16>, vector<2x128xf32> -> vector<2x128xf32>
    %124 = arith.truncf %121 : vector<2x32xf32> to vector<2x32xbf16>
    %cst_31 = arith.constant dense<0.000000e+00> : vector<2x128xf32>
    %125 = tpu.matmul %124, %1, %cst_31 {dimension_numbers = #tpu.dot_dimension_numbers<[1], [0], [0], [1], [0, 0, 1, 1], [], []>} : vector<2x32xbf16>, vector<32x128xbf16>, vector<2x128xf32> -> vector<2x128xf32>
    %126 = arith.addf %125, %123 : vector<2x128xf32>
    %127 = vector.broadcast %5 : vector<1x128xf32> to vector<2x128xf32>
    %128 = arith.addf %126, %127 : vector<2x128xf32>
    %129 = arith.negf %128 : vector<2x128xf32>
    %130 = math.exp %129 : vector<2x128xf32>
    %cst_32 = arith.constant 1.000000e+00 : f32
    %131 = vector.broadcast %cst_32 : f32 to vector<2x128xf32>
    %132 = arith.addf %131, %130 : vector<2x128xf32>
    %133 = arith.divf %131, %132 : vector<2x128xf32>
    %134 = math.tanh %128 : vector<2x128xf32>
    %135 = vector.extract_strided_slice %133 {offsets = [0, 0], sizes = [2, 32], strides = [1, 1]} : vector<2x128xf32> to vector<2x32xf32>
    %136 = vector.extract_strided_slice %133 {offsets = [0, 32], sizes = [2, 32], strides = [1, 1]} : vector<2x128xf32> to vector<2x32xf32>
    %137 = vector.extract_strided_slice %134 {offsets = [0, 64], sizes = [2, 32], strides = [1, 1]} : vector<2x128xf32> to vector<2x32xf32>
    %138 = vector.extract_strided_slice %133 {offsets = [0, 96], sizes = [2, 32], strides = [1, 1]} : vector<2x128xf32> to vector<2x32xf32>
    %139 = arith.mulf %136, %99 : vector<2x32xf32>
    %140 = arith.mulf %135, %137 : vector<2x32xf32>
    %141 = arith.addf %139, %140 : vector<2x32xf32>
    %142 = math.tanh %141 : vector<2x32xf32>
    %143 = arith.mulf %138, %142 : vector<2x32xf32>
    %144 = arith.truncf %121 : vector<2x32xf32> to vector<2x32xbf16>
    %cst_33 = arith.constant dense<0.000000e+00> : vector<2x128xf32>
    %145 = tpu.matmul %144, %2, %cst_33 {dimension_numbers = #tpu.dot_dimension_numbers<[1], [0], [0], [1], [0, 0, 1, 1], [], []>} : vector<2x32xbf16>, vector<32x128xbf16>, vector<2x128xf32> -> vector<2x128xf32>
    %146 = vector.extract_strided_slice %13 {offsets = [0, 3, 0], sizes = [2, 1, 128], strides = [1, 1, 1]} : vector<2x8x128xf32> to vector<2x1x128xf32>
    %147 = vector.shape_cast %146 : vector<2x1x128xf32> to vector<2x128xf32>
    %148 = arith.addf %147, %145 : vector<2x128xf32>
    %149 = arith.negf %148 : vector<2x128xf32>
    %150 = math.exp %149 : vector<2x128xf32>
    %cst_34 = arith.constant 1.000000e+00 : f32
    %151 = vector.broadcast %cst_34 : f32 to vector<2x128xf32>
    %152 = arith.addf %151, %150 : vector<2x128xf32>
    %153 = arith.divf %151, %152 : vector<2x128xf32>
    %154 = math.tanh %148 : vector<2x128xf32>
    %155 = vector.extract_strided_slice %153 {offsets = [0, 0], sizes = [2, 32], strides = [1, 1]} : vector<2x128xf32> to vector<2x32xf32>
    %156 = vector.extract_strided_slice %153 {offsets = [0, 32], sizes = [2, 32], strides = [1, 1]} : vector<2x128xf32> to vector<2x32xf32>
    %157 = vector.extract_strided_slice %154 {offsets = [0, 64], sizes = [2, 32], strides = [1, 1]} : vector<2x128xf32> to vector<2x32xf32>
    %158 = vector.extract_strided_slice %153 {offsets = [0, 96], sizes = [2, 32], strides = [1, 1]} : vector<2x128xf32> to vector<2x32xf32>
    %159 = arith.mulf %156, %119 : vector<2x32xf32>
    %160 = arith.mulf %155, %157 : vector<2x32xf32>
    %161 = arith.addf %159, %160 : vector<2x32xf32>
    %162 = math.tanh %161 : vector<2x32xf32>
    %163 = arith.mulf %158, %162 : vector<2x32xf32>
    %164 = arith.truncf %143 : vector<2x32xf32> to vector<2x32xbf16>
    %cst_35 = arith.constant dense<0.000000e+00> : vector<2x128xf32>
    %165 = tpu.matmul %164, %3, %cst_35 {dimension_numbers = #tpu.dot_dimension_numbers<[1], [0], [0], [1], [0, 0, 1, 1], [], []>} : vector<2x32xbf16>, vector<32x128xbf16>, vector<2x128xf32> -> vector<2x128xf32>
    %166 = arith.truncf %163 : vector<2x32xf32> to vector<2x32xbf16>
    %cst_36 = arith.constant dense<0.000000e+00> : vector<2x128xf32>
    %167 = tpu.matmul %166, %1, %cst_36 {dimension_numbers = #tpu.dot_dimension_numbers<[1], [0], [0], [1], [0, 0, 1, 1], [], []>} : vector<2x32xbf16>, vector<32x128xbf16>, vector<2x128xf32> -> vector<2x128xf32>
    %168 = arith.addf %167, %165 : vector<2x128xf32>
    %169 = vector.broadcast %5 : vector<1x128xf32> to vector<2x128xf32>
    %170 = arith.addf %168, %169 : vector<2x128xf32>
    %171 = arith.negf %170 : vector<2x128xf32>
    %172 = math.exp %171 : vector<2x128xf32>
    %cst_37 = arith.constant 1.000000e+00 : f32
    %173 = vector.broadcast %cst_37 : f32 to vector<2x128xf32>
    %174 = arith.addf %173, %172 : vector<2x128xf32>
    %175 = arith.divf %173, %174 : vector<2x128xf32>
    %176 = math.tanh %170 : vector<2x128xf32>
    %177 = vector.extract_strided_slice %175 {offsets = [0, 0], sizes = [2, 32], strides = [1, 1]} : vector<2x128xf32> to vector<2x32xf32>
    %178 = vector.extract_strided_slice %175 {offsets = [0, 32], sizes = [2, 32], strides = [1, 1]} : vector<2x128xf32> to vector<2x32xf32>
    %179 = vector.extract_strided_slice %176 {offsets = [0, 64], sizes = [2, 32], strides = [1, 1]} : vector<2x128xf32> to vector<2x32xf32>
    %180 = vector.extract_strided_slice %175 {offsets = [0, 96], sizes = [2, 32], strides = [1, 1]} : vector<2x128xf32> to vector<2x32xf32>
    %181 = arith.mulf %178, %141 : vector<2x32xf32>
    %182 = arith.mulf %177, %179 : vector<2x32xf32>
    %183 = arith.addf %181, %182 : vector<2x32xf32>
    %184 = math.tanh %183 : vector<2x32xf32>
    %185 = arith.mulf %180, %184 : vector<2x32xf32>
    %186 = arith.truncf %163 : vector<2x32xf32> to vector<2x32xbf16>
    %cst_38 = arith.constant dense<0.000000e+00> : vector<2x128xf32>
    %187 = tpu.matmul %186, %2, %cst_38 {dimension_numbers = #tpu.dot_dimension_numbers<[1], [0], [0], [1], [0, 0, 1, 1], [], []>} : vector<2x32xbf16>, vector<32x128xbf16>, vector<2x128xf32> -> vector<2x128xf32>
    %188 = vector.extract_strided_slice %13 {offsets = [0, 4, 0], sizes = [2, 1, 128], strides = [1, 1, 1]} : vector<2x8x128xf32> to vector<2x1x128xf32>
    %189 = vector.shape_cast %188 : vector<2x1x128xf32> to vector<2x128xf32>
    %190 = arith.addf %189, %187 : vector<2x128xf32>
    %191 = arith.negf %190 : vector<2x128xf32>
    %192 = math.exp %191 : vector<2x128xf32>
    %cst_39 = arith.constant 1.000000e+00 : f32
    %193 = vector.broadcast %cst_39 : f32 to vector<2x128xf32>
    %194 = arith.addf %193, %192 : vector<2x128xf32>
    %195 = arith.divf %193, %194 : vector<2x128xf32>
    %196 = math.tanh %190 : vector<2x128xf32>
    %197 = vector.extract_strided_slice %195 {offsets = [0, 0], sizes = [2, 32], strides = [1, 1]} : vector<2x128xf32> to vector<2x32xf32>
    %198 = vector.extract_strided_slice %195 {offsets = [0, 32], sizes = [2, 32], strides = [1, 1]} : vector<2x128xf32> to vector<2x32xf32>
    %199 = vector.extract_strided_slice %196 {offsets = [0, 64], sizes = [2, 32], strides = [1, 1]} : vector<2x128xf32> to vector<2x32xf32>
    %200 = vector.extract_strided_slice %195 {offsets = [0, 96], sizes = [2, 32], strides = [1, 1]} : vector<2x128xf32> to vector<2x32xf32>
    %201 = arith.mulf %198, %161 : vector<2x32xf32>
    %202 = arith.mulf %197, %199 : vector<2x32xf32>
    %203 = arith.addf %201, %202 : vector<2x32xf32>
    %204 = math.tanh %203 : vector<2x32xf32>
    %205 = arith.mulf %200, %204 : vector<2x32xf32>
    %206 = arith.truncf %185 : vector<2x32xf32> to vector<2x32xbf16>
    %cst_40 = arith.constant dense<0.000000e+00> : vector<2x128xf32>
    %207 = tpu.matmul %206, %3, %cst_40 {dimension_numbers = #tpu.dot_dimension_numbers<[1], [0], [0], [1], [0, 0, 1, 1], [], []>} : vector<2x32xbf16>, vector<32x128xbf16>, vector<2x128xf32> -> vector<2x128xf32>
    %208 = arith.truncf %205 : vector<2x32xf32> to vector<2x32xbf16>
    %cst_41 = arith.constant dense<0.000000e+00> : vector<2x128xf32>
    %209 = tpu.matmul %208, %1, %cst_41 {dimension_numbers = #tpu.dot_dimension_numbers<[1], [0], [0], [1], [0, 0, 1, 1], [], []>} : vector<2x32xbf16>, vector<32x128xbf16>, vector<2x128xf32> -> vector<2x128xf32>
    %210 = arith.addf %209, %207 : vector<2x128xf32>
    %211 = vector.broadcast %5 : vector<1x128xf32> to vector<2x128xf32>
    %212 = arith.addf %210, %211 : vector<2x128xf32>
    %213 = arith.negf %212 : vector<2x128xf32>
    %214 = math.exp %213 : vector<2x128xf32>
    %cst_42 = arith.constant 1.000000e+00 : f32
    %215 = vector.broadcast %cst_42 : f32 to vector<2x128xf32>
    %216 = arith.addf %215, %214 : vector<2x128xf32>
    %217 = arith.divf %215, %216 : vector<2x128xf32>
    %218 = math.tanh %212 : vector<2x128xf32>
    %219 = vector.extract_strided_slice %217 {offsets = [0, 0], sizes = [2, 32], strides = [1, 1]} : vector<2x128xf32> to vector<2x32xf32>
    %220 = vector.extract_strided_slice %217 {offsets = [0, 32], sizes = [2, 32], strides = [1, 1]} : vector<2x128xf32> to vector<2x32xf32>
    %221 = vector.extract_strided_slice %218 {offsets = [0, 64], sizes = [2, 32], strides = [1, 1]} : vector<2x128xf32> to vector<2x32xf32>
    %222 = vector.extract_strided_slice %217 {offsets = [0, 96], sizes = [2, 32], strides = [1, 1]} : vector<2x128xf32> to vector<2x32xf32>
    %223 = arith.mulf %220, %183 : vector<2x32xf32>
    %224 = arith.mulf %219, %221 : vector<2x32xf32>
    %225 = arith.addf %223, %224 : vector<2x32xf32>
    %226 = math.tanh %225 : vector<2x32xf32>
    %227 = arith.mulf %222, %226 : vector<2x32xf32>
    %228 = arith.truncf %205 : vector<2x32xf32> to vector<2x32xbf16>
    %cst_43 = arith.constant dense<0.000000e+00> : vector<2x128xf32>
    %229 = tpu.matmul %228, %2, %cst_43 {dimension_numbers = #tpu.dot_dimension_numbers<[1], [0], [0], [1], [0, 0, 1, 1], [], []>} : vector<2x32xbf16>, vector<32x128xbf16>, vector<2x128xf32> -> vector<2x128xf32>
    %230 = vector.extract_strided_slice %13 {offsets = [0, 5, 0], sizes = [2, 1, 128], strides = [1, 1, 1]} : vector<2x8x128xf32> to vector<2x1x128xf32>
    %231 = vector.shape_cast %230 : vector<2x1x128xf32> to vector<2x128xf32>
    %232 = arith.addf %231, %229 : vector<2x128xf32>
    %233 = arith.negf %232 : vector<2x128xf32>
    %234 = math.exp %233 : vector<2x128xf32>
    %cst_44 = arith.constant 1.000000e+00 : f32
    %235 = vector.broadcast %cst_44 : f32 to vector<2x128xf32>
    %236 = arith.addf %235, %234 : vector<2x128xf32>
    %237 = arith.divf %235, %236 : vector<2x128xf32>
    %238 = math.tanh %232 : vector<2x128xf32>
    %239 = vector.extract_strided_slice %237 {offsets = [0, 0], sizes = [2, 32], strides = [1, 1]} : vector<2x128xf32> to vector<2x32xf32>
    %240 = vector.extract_strided_slice %237 {offsets = [0, 32], sizes = [2, 32], strides = [1, 1]} : vector<2x128xf32> to vector<2x32xf32>
    %241 = vector.extract_strided_slice %238 {offsets = [0, 64], sizes = [2, 32], strides = [1, 1]} : vector<2x128xf32> to vector<2x32xf32>
    %242 = vector.extract_strided_slice %237 {offsets = [0, 96], sizes = [2, 32], strides = [1, 1]} : vector<2x128xf32> to vector<2x32xf32>
    %243 = arith.mulf %240, %203 : vector<2x32xf32>
    %244 = arith.mulf %239, %241 : vector<2x32xf32>
    %245 = arith.addf %243, %244 : vector<2x32xf32>
    %246 = math.tanh %245 : vector<2x32xf32>
    %247 = arith.mulf %242, %246 : vector<2x32xf32>
    %248 = arith.truncf %227 : vector<2x32xf32> to vector<2x32xbf16>
    %cst_45 = arith.constant dense<0.000000e+00> : vector<2x128xf32>
    %249 = tpu.matmul %248, %3, %cst_45 {dimension_numbers = #tpu.dot_dimension_numbers<[1], [0], [0], [1], [0, 0, 1, 1], [], []>} : vector<2x32xbf16>, vector<32x128xbf16>, vector<2x128xf32> -> vector<2x128xf32>
    %250 = arith.truncf %247 : vector<2x32xf32> to vector<2x32xbf16>
    %cst_46 = arith.constant dense<0.000000e+00> : vector<2x128xf32>
    %251 = tpu.matmul %250, %1, %cst_46 {dimension_numbers = #tpu.dot_dimension_numbers<[1], [0], [0], [1], [0, 0, 1, 1], [], []>} : vector<2x32xbf16>, vector<32x128xbf16>, vector<2x128xf32> -> vector<2x128xf32>
    %252 = arith.addf %251, %249 : vector<2x128xf32>
    %253 = vector.broadcast %5 : vector<1x128xf32> to vector<2x128xf32>
    %254 = arith.addf %252, %253 : vector<2x128xf32>
    %255 = arith.negf %254 : vector<2x128xf32>
    %256 = math.exp %255 : vector<2x128xf32>
    %cst_47 = arith.constant 1.000000e+00 : f32
    %257 = vector.broadcast %cst_47 : f32 to vector<2x128xf32>
    %258 = arith.addf %257, %256 : vector<2x128xf32>
    %259 = arith.divf %257, %258 : vector<2x128xf32>
    %260 = math.tanh %254 : vector<2x128xf32>
    %261 = vector.extract_strided_slice %259 {offsets = [0, 0], sizes = [2, 32], strides = [1, 1]} : vector<2x128xf32> to vector<2x32xf32>
    %262 = vector.extract_strided_slice %259 {offsets = [0, 32], sizes = [2, 32], strides = [1, 1]} : vector<2x128xf32> to vector<2x32xf32>
    %263 = vector.extract_strided_slice %260 {offsets = [0, 64], sizes = [2, 32], strides = [1, 1]} : vector<2x128xf32> to vector<2x32xf32>
    %264 = vector.extract_strided_slice %259 {offsets = [0, 96], sizes = [2, 32], strides = [1, 1]} : vector<2x128xf32> to vector<2x32xf32>
    %265 = arith.mulf %262, %225 : vector<2x32xf32>
    %266 = arith.mulf %261, %263 : vector<2x32xf32>
    %267 = arith.addf %265, %266 : vector<2x32xf32>
    %268 = math.tanh %267 : vector<2x32xf32>
    %269 = arith.mulf %264, %268 : vector<2x32xf32>
    %270 = arith.truncf %247 : vector<2x32xf32> to vector<2x32xbf16>
    %cst_48 = arith.constant dense<0.000000e+00> : vector<2x128xf32>
    %271 = tpu.matmul %270, %2, %cst_48 {dimension_numbers = #tpu.dot_dimension_numbers<[1], [0], [0], [1], [0, 0, 1, 1], [], []>} : vector<2x32xbf16>, vector<32x128xbf16>, vector<2x128xf32> -> vector<2x128xf32>
    %272 = vector.extract_strided_slice %13 {offsets = [0, 6, 0], sizes = [2, 1, 128], strides = [1, 1, 1]} : vector<2x8x128xf32> to vector<2x1x128xf32>
    %273 = vector.shape_cast %272 : vector<2x1x128xf32> to vector<2x128xf32>
    %274 = arith.addf %273, %271 : vector<2x128xf32>
    %275 = arith.negf %274 : vector<2x128xf32>
    %276 = math.exp %275 : vector<2x128xf32>
    %cst_49 = arith.constant 1.000000e+00 : f32
    %277 = vector.broadcast %cst_49 : f32 to vector<2x128xf32>
    %278 = arith.addf %277, %276 : vector<2x128xf32>
    %279 = arith.divf %277, %278 : vector<2x128xf32>
    %280 = math.tanh %274 : vector<2x128xf32>
    %281 = vector.extract_strided_slice %279 {offsets = [0, 0], sizes = [2, 32], strides = [1, 1]} : vector<2x128xf32> to vector<2x32xf32>
    %282 = vector.extract_strided_slice %279 {offsets = [0, 32], sizes = [2, 32], strides = [1, 1]} : vector<2x128xf32> to vector<2x32xf32>
    %283 = vector.extract_strided_slice %280 {offsets = [0, 64], sizes = [2, 32], strides = [1, 1]} : vector<2x128xf32> to vector<2x32xf32>
    %284 = vector.extract_strided_slice %279 {offsets = [0, 96], sizes = [2, 32], strides = [1, 1]} : vector<2x128xf32> to vector<2x32xf32>
    %285 = arith.mulf %282, %245 : vector<2x32xf32>
    %286 = arith.mulf %281, %283 : vector<2x32xf32>
    %287 = arith.addf %285, %286 : vector<2x32xf32>
    %288 = math.tanh %287 : vector<2x32xf32>
    %289 = arith.mulf %284, %288 : vector<2x32xf32>
    %290 = arith.truncf %269 : vector<2x32xf32> to vector<2x32xbf16>
    %cst_50 = arith.constant dense<0.000000e+00> : vector<2x128xf32>
    %291 = tpu.matmul %290, %3, %cst_50 {dimension_numbers = #tpu.dot_dimension_numbers<[1], [0], [0], [1], [0, 0, 1, 1], [], []>} : vector<2x32xbf16>, vector<32x128xbf16>, vector<2x128xf32> -> vector<2x128xf32>
    %292 = arith.truncf %289 : vector<2x32xf32> to vector<2x32xbf16>
    %cst_51 = arith.constant dense<0.000000e+00> : vector<2x128xf32>
    %293 = tpu.matmul %292, %1, %cst_51 {dimension_numbers = #tpu.dot_dimension_numbers<[1], [0], [0], [1], [0, 0, 1, 1], [], []>} : vector<2x32xbf16>, vector<32x128xbf16>, vector<2x128xf32> -> vector<2x128xf32>
    %294 = arith.addf %293, %291 : vector<2x128xf32>
    %295 = vector.broadcast %5 : vector<1x128xf32> to vector<2x128xf32>
    %296 = arith.addf %294, %295 : vector<2x128xf32>
    %297 = arith.negf %296 : vector<2x128xf32>
    %298 = math.exp %297 : vector<2x128xf32>
    %cst_52 = arith.constant 1.000000e+00 : f32
    %299 = vector.broadcast %cst_52 : f32 to vector<2x128xf32>
    %300 = arith.addf %299, %298 : vector<2x128xf32>
    %301 = arith.divf %299, %300 : vector<2x128xf32>
    %302 = math.tanh %296 : vector<2x128xf32>
    %303 = vector.extract_strided_slice %301 {offsets = [0, 0], sizes = [2, 32], strides = [1, 1]} : vector<2x128xf32> to vector<2x32xf32>
    %304 = vector.extract_strided_slice %301 {offsets = [0, 32], sizes = [2, 32], strides = [1, 1]} : vector<2x128xf32> to vector<2x32xf32>
    %305 = vector.extract_strided_slice %302 {offsets = [0, 64], sizes = [2, 32], strides = [1, 1]} : vector<2x128xf32> to vector<2x32xf32>
    %306 = vector.extract_strided_slice %301 {offsets = [0, 96], sizes = [2, 32], strides = [1, 1]} : vector<2x128xf32> to vector<2x32xf32>
    %307 = arith.mulf %304, %267 : vector<2x32xf32>
    %308 = arith.mulf %303, %305 : vector<2x32xf32>
    %309 = arith.addf %307, %308 : vector<2x32xf32>
    %310 = math.tanh %309 : vector<2x32xf32>
    %311 = arith.mulf %306, %310 : vector<2x32xf32>
    %312 = arith.truncf %289 : vector<2x32xf32> to vector<2x32xbf16>
    %cst_53 = arith.constant dense<0.000000e+00> : vector<2x128xf32>
    %313 = tpu.matmul %312, %2, %cst_53 {dimension_numbers = #tpu.dot_dimension_numbers<[1], [0], [0], [1], [0, 0, 1, 1], [], []>} : vector<2x32xbf16>, vector<32x128xbf16>, vector<2x128xf32> -> vector<2x128xf32>
    %314 = vector.extract_strided_slice %13 {offsets = [0, 7, 0], sizes = [2, 1, 128], strides = [1, 1, 1]} : vector<2x8x128xf32> to vector<2x1x128xf32>
    %315 = vector.shape_cast %314 : vector<2x1x128xf32> to vector<2x128xf32>
    %316 = arith.addf %315, %313 : vector<2x128xf32>
    %317 = arith.negf %316 : vector<2x128xf32>
    %318 = math.exp %317 : vector<2x128xf32>
    %cst_54 = arith.constant 1.000000e+00 : f32
    %319 = vector.broadcast %cst_54 : f32 to vector<2x128xf32>
    %320 = arith.addf %319, %318 : vector<2x128xf32>
    %321 = arith.divf %319, %320 : vector<2x128xf32>
    %322 = math.tanh %316 : vector<2x128xf32>
    %323 = vector.extract_strided_slice %321 {offsets = [0, 0], sizes = [2, 32], strides = [1, 1]} : vector<2x128xf32> to vector<2x32xf32>
    %324 = vector.extract_strided_slice %321 {offsets = [0, 32], sizes = [2, 32], strides = [1, 1]} : vector<2x128xf32> to vector<2x32xf32>
    %325 = vector.extract_strided_slice %322 {offsets = [0, 64], sizes = [2, 32], strides = [1, 1]} : vector<2x128xf32> to vector<2x32xf32>
    %326 = vector.extract_strided_slice %321 {offsets = [0, 96], sizes = [2, 32], strides = [1, 1]} : vector<2x128xf32> to vector<2x32xf32>
    %327 = arith.mulf %324, %287 : vector<2x32xf32>
    %328 = arith.mulf %323, %325 : vector<2x32xf32>
    %329 = arith.addf %327, %328 : vector<2x32xf32>
    %330 = math.tanh %329 : vector<2x32xf32>
    %331 = arith.mulf %326, %330 : vector<2x32xf32>
    %332 = arith.truncf %311 : vector<2x32xf32> to vector<2x32xbf16>
    %cst_55 = arith.constant dense<0.000000e+00> : vector<2x128xf32>
    %333 = tpu.matmul %332, %3, %cst_55 {dimension_numbers = #tpu.dot_dimension_numbers<[1], [0], [0], [1], [0, 0, 1, 1], [], []>} : vector<2x32xbf16>, vector<32x128xbf16>, vector<2x128xf32> -> vector<2x128xf32>
    %334 = arith.truncf %331 : vector<2x32xf32> to vector<2x32xbf16>
    %cst_56 = arith.constant dense<0.000000e+00> : vector<2x128xf32>
    %335 = tpu.matmul %334, %1, %cst_56 {dimension_numbers = #tpu.dot_dimension_numbers<[1], [0], [0], [1], [0, 0, 1, 1], [], []>} : vector<2x32xbf16>, vector<32x128xbf16>, vector<2x128xf32> -> vector<2x128xf32>
    %336 = arith.addf %335, %333 : vector<2x128xf32>
    %337 = vector.broadcast %5 : vector<1x128xf32> to vector<2x128xf32>
    %338 = arith.addf %336, %337 : vector<2x128xf32>
    %339 = arith.negf %338 : vector<2x128xf32>
    %340 = math.exp %339 : vector<2x128xf32>
    %cst_57 = arith.constant 1.000000e+00 : f32
    %341 = vector.broadcast %cst_57 : f32 to vector<2x128xf32>
    %342 = arith.addf %341, %340 : vector<2x128xf32>
    %343 = arith.divf %341, %342 : vector<2x128xf32>
    %344 = math.tanh %338 : vector<2x128xf32>
    %345 = vector.extract_strided_slice %343 {offsets = [0, 0], sizes = [2, 32], strides = [1, 1]} : vector<2x128xf32> to vector<2x32xf32>
    %346 = vector.extract_strided_slice %343 {offsets = [0, 32], sizes = [2, 32], strides = [1, 1]} : vector<2x128xf32> to vector<2x32xf32>
    %347 = vector.extract_strided_slice %344 {offsets = [0, 64], sizes = [2, 32], strides = [1, 1]} : vector<2x128xf32> to vector<2x32xf32>
    %348 = vector.extract_strided_slice %343 {offsets = [0, 96], sizes = [2, 32], strides = [1, 1]} : vector<2x128xf32> to vector<2x32xf32>
    %349 = arith.mulf %346, %309 : vector<2x32xf32>
    %350 = arith.mulf %345, %347 : vector<2x32xf32>
    %351 = arith.addf %349, %350 : vector<2x32xf32>
    %352 = math.tanh %351 : vector<2x32xf32>
    %353 = arith.mulf %348, %352 : vector<2x32xf32>
    %cst_58 = arith.constant 0.000000e+00 : f32
    %354 = vector.broadcast %cst_58 : f32 to vector<2x32xf32>
    %355 = arith.maximumf %353, %354 : vector<2x32xf32>
    %356 = arith.truncf %355 : vector<2x32xf32> to vector<2x32xbf16>
    %c0_59 = arith.constant 0 : index
    %c0_60 = arith.constant 0 : index
    %357 = vector.load %arg7[%c0_59, %c0_60] : memref<32x128xbf16, #tpu.memory_space<vmem>>, vector<32x128xbf16>
    %cst_61 = arith.constant dense<0.000000e+00> : vector<2x128xf32>
    %358 = tpu.matmul %356, %357, %cst_61 {dimension_numbers = #tpu.dot_dimension_numbers<[1], [0], [0], [1], [0, 0, 1, 1], [], []>} : vector<2x32xbf16>, vector<32x128xbf16>, vector<2x128xf32> -> vector<2x128xf32>
    %c0_62 = arith.constant 0 : index
    %c0_63 = arith.constant 0 : index
    %359 = vector.load %arg8[%c0_62, %c0_63] : memref<1x128xf32, #tpu.memory_space<vmem>>, vector<1x128xf32>
    %360 = vector.broadcast %359 : vector<1x128xf32> to vector<2x128xf32>
    %361 = arith.addf %358, %360 : vector<2x128xf32>
    %cst_64 = arith.constant 0.000000e+00 : f32
    %362 = vector.broadcast %cst_64 : f32 to vector<2x128xf32>
    %363 = arith.maximumf %361, %362 : vector<2x128xf32>
    %364 = arith.truncf %363 : vector<2x128xf32> to vector<2x128xbf16>
    %c0_65 = arith.constant 0 : index
    %c0_66 = arith.constant 0 : index
    %365 = vector.load %arg9[%c0_65, %c0_66] : memref<128x5xbf16, #tpu.memory_space<vmem>>, vector<128x5xbf16>
    %cst_67 = arith.constant dense<0.000000e+00> : vector<2x5xf32>
    %366 = tpu.matmul %364, %365, %cst_67 {dimension_numbers = #tpu.dot_dimension_numbers<[1], [0], [0], [1], [0, 0, 1, 1], [], []>} : vector<2x128xbf16>, vector<128x5xbf16>, vector<2x5xf32> -> vector<2x5xf32>
    %c0_68 = arith.constant 0 : index
    %c0_69 = arith.constant 0 : index
    %367 = vector.load %arg10[%c0_68, %c0_69] : memref<1x5xf32, #tpu.memory_space<vmem>>, vector<1x5xf32>
    %368 = vector.broadcast %367 : vector<1x5xf32> to vector<2x5xf32>
    %369 = arith.addf %366, %368 : vector<2x5xf32>
    %c0_70 = arith.constant 0 : index
    %c0_71 = arith.constant 0 : index
    %370 = vector.load %arg11[%c0_70, %c0_71] : memref<2x5xf32, #tpu.memory_space<vmem>>, vector<2x5xf32>
    tpu.vector_store %arg11[%c0_70, %c0_71], %369 {strides = array<i32>} : memref<2x5xf32, #tpu.memory_space<vmem>>, vector<2x5xf32>,
    return
  }
}

</mosaic_0001>

<bundles_post_ra>
// kernel: lstm_model_forward.1
= control target key start
LH: loop header
LB: loop body
LE: loop exit
PB: predicated region body
PF: predicated region fallthrough
CT: control target
= control target key end

     0   :  { %vm62_vm0 = vcmask 1041408   ;;  %v2792_v2 = vmov 0.0   ;;  %vm2793_vm1 = vmmov 0   ;;  %vm58_vm2 = vcmask 31744   ;;  %s3367_s0 = inlined_call_operand.vmem [shape: f32[2,8,4], index: 0, kind: input, shape index: {}]   ;;  %s3368_s1 = inlined_call_operand.vmem [shape: bf16[4,128], index: 1, kind: input, shape index: {}]   ;;  %s3369_s2 = inlined_call_operand.vmem [shape: bf16[32,128], index: 2, kind: input, shape index: {}]   ;;  %s3370_s3 = inlined_call_operand.vmem [shape: f32[1,128], index: 3, kind: input, shape index: {}]   ;;  %s3371_s4 = inlined_call_operand.vmem [shape: bf16[32,128], index: 4, kind: input, shape index: {}]   ;;  %s3372_s5 = inlined_call_operand.vmem [shape: bf16[32,128], index: 5, kind: input, shape index: {}]   ;;  %s3373_s6 = inlined_call_operand.vmem [shape: f32[1,128], index: 6, kind: input, shape index: {}]   ;;  %s3374_s7 = inlined_call_operand.vmem [shape: bf16[32,128], index: 7, kind: input, shape index: {}]   ;;  %s3375_s8 = inlined_call_operand.vmem [shape: f32[1,128], index: 8, kind: input, shape index: {}]   ;;  %s3376_s9 = inlined_call_operand.vmem [shape: bf16[128,5], index: 9, kind: input, shape index: {}]   ;;  %s3377_s10 = inlined_call_operand.vmem [shape: f32[1,5], index: 10, kind: input, shape index: {}]   ;;  %s3378_s11 = inlined_call_operand.hbm [shape: f32[2,5], index: 11, kind: output, shape index: {}]  }
   0x1   :  { %v40_v0 = vld [vmem:[%s3368_s1] sm:$0x3]  ;;  %2323 = vmatprep.subr.bf16.mxu1 %v2792_v2  ;;  %2325 = vmatprep.mubr.msk.bf16.mxu1 %vm2793_vm1, %v2792_v2  ;;  %v56_v4 = vld [vmem:[%s3367_s0 + $0x8] sm:$0xff]  ;;  %v2794_v8 = vmov 0  }
   0x2   :  { %v55_v1 = vld [vmem:[%s3367_s0] sm:$0xff]  ;;  %v64_v3 = vsel %vm62_vm0, %v40_v0, 0  ;;  %v2873_v5 = vld [vmem:[%s3369_s2 + $0x8] sm:$0xff]   ;;  %2353 = vmatprep.subr.bf16.mxu0 %v2792_v2  ;;  %2357 = vmatprep.mubr.msk.bf16.mxu0 %vm2793_vm1, %v2792_v2 }
   0x3   :  { %2324 = vmatpush3.bf16.msra.mxu1 %v64_v3  ;;  %v57_v6 = vpack.c.bf16 %v56_v4, %v55_v1  ;;  %v2880_v7 = vld [vmem:[%s3369_s2] sm:$0xff]   ;;  %2354 = vmatpush3.bf16.msra.mxu0 %v2873_v5 }
   0x4   :  { %2329 = vmatprep.subr.bf16.mxu1 %v2792_v2  ;;  %2355 = vmatprep.subr.bf16.mxu0 %v2792_v2 }
   0x6   :  { %2326 = vmatmul.mubr.msk.bf16.vlgmr.msra.gmra.mxu1 %vm58_vm2, %v57_v6 }
   0x7   :  { %2330 = vmatpush3.bf16.msra.mxu1 %v2873_v5  ;;  %2333 = vmatprep.mubr.msk.bf16.mxu1 %vm2793_vm1, %v2792_v2 }
   0x8   :  { %2331 = vmatprep.subr.bf16.mxu1 %v2792_v2  ;;  %2356 = vmatpush3.bf16.msra.mxu0 %v2880_v7 }
   0x9   :  { %2369 = vmatprep.subr.bf16.mxu0 %v2792_v2 }
   0xb   :  { %2332 = vmatpush3.bf16.msra.mxu1 %v2880_v7 }
   0xc   :  { %2337 = vmatprep.subr.bf16.mxu1 %v2792_v2 }
   0xe   :  { %2334 = vmatmul.mubr.bf16.vlgmr.msra.gmra.mxu1 %v2794_v8 }
   0xf   :  { %16 = vsyncpa [#allocation3], 0  ;;  %2341 = vmatprep.mubr.msk.bf16.mxu1 %vm2793_vm1, %v2792_v2  ;;  %v2170_v13 = vld [vmem:[%s3370_s3] ss:$0 sm:$0xff]  ;;  %s2795_s27 = smov 64   ;;  %s2796_s3 = smov 32  }
  0x10   :  { %v2919_v44 = vld [vmem:[%s3372_s5 + $0x8] sm:$0xff]   ;;  %v2925_v45 = vld [vmem:[%s3372_s5] sm:$0xff]   ;;  %vm284_vm3 = vcmask 1041409   ;;  %vm127_vm4 = vcmask 261120   ;;  %s2797_s28 = smov [#allocation2]   ;;  %vm2153_vm5 = vcmask 33792  }
  0x11   :  { %2338 = vmatpush3.bf16.msra.mxu1 %v2919_v44  ;;  %v2933_v47 = vld [vmem:[%s3371_s4 + $0x8] sm:$0xff]   ;;  %v2940_v48 = vld [vmem:[%s3371_s4] sm:$0xff]  }
  0x12   :  { %2339 = vmatprep.subr.bf16.mxu1 %v2792_v2  ;;  %v2966_v1 = vld [vmem:[%s3373_s6] ss:$0 sm:$0xff] }
  0x15   :  { %2340 = vmatpush3.bf16.msra.mxu1 %v2925_v45 }
  0x16   :  { %2345 = vmatprep.subr.bf16.mxu1 %v2792_v2 }
  0x18   :  { %2342 = vmatmul.mubr.bf16.vlgmr.msra.gmra.mxu1 %v2794_v8 }
  0x19   :  { %2346 = vmatpush3.bf16.msra.mxu1 %v2933_v47  ;;  %2349 = vmatprep.mubr.msk.bf16.mxu1 %vm2793_vm1, %v2792_v2 }
  0x1a   :  { %2347 = vmatprep.subr.bf16.mxu1 %v2792_v2 }
  0x1d   :  { %2348 = vmatpush3.bf16.msra.mxu1 %v2940_v48 }
  0x1e   :  { %2361 = vmatprep.subr.bf16.mxu1 %v2792_v2 }
  0xc6   :  { %v100_v9 = vpop.f32.mrf.mxu1 }
  0xc7   :  { %v2902_v19 = vadd.f32 %v2170_v13, %v100_v9 }
  0xc8   :  { %v2327_v10 = vpop.f32.mrf.mxu1 }
  0xca   :  { %v103_v11 = vpop.f32.mrf.mxu1 }
  0xcb   :  { %v2899_v15 = vadd.f32 %v2170_v13, %v103_v11 }
  0xcc   :  { %v2328_v12 = vpop.f32.mrf.mxu1 }
  0xce   :  { %v165_v14 = vpop.f32.mrf.mxu1 }
  0xcf   :  { %v172_v16 = vrot.slane %v165_v14, 1  ;;  %v175_v21 = vadd.f32 %v165_v14, %v2902_v19 }
  0xd0   :  { %v2335_v17 = vpop.f32.mrf.mxu1 }
  0xd1   :  { %v176_v18 = vadd.f32 %v172_v16, %v2899_v15  ;;  %v2173_v26 = vmul.f32 -1.442695, %v175_v21 }
  0xd2   :  { %v168_v20 = vpop.f32.mrf.mxu1 }
  0xd3   :  { %2571 = vtanh.f32 %v176_v18  ;;  %v2174_v25 = vmul.f32 -1.442695, %v176_v18 }
  0xd4   :  { %v2336_v22 = vpop.f32.mrf.mxu1  ;;  %2573 = vtanh.f32 %v175_v21 }
  0xd5   :  { %2575 = vpow2.f32 %v2174_v25 }
  0xd6   :  { %2577 = vpow2.f32 %v2173_v26 }
  0xd8   :  { %v271_v60 = vpop.f32.mrf.mxu1 }
  0xda   :  { %v2343_v61 = vpop.f32.mrf.mxu1 }
  0xdc   :  { %v274_v62 = vpop.f32.mrf.mxu1 }
  0xde   :  { %v2344_v63 = vpop.f32.mrf.mxu1 }
  0xe0   :  { %v2572_v23 = vpop.eup %2571 }
  0xe1   :  { %197 = vrot.lane.b32.xlu0 %v2572_v23, %s2795_s27  ;;  %v2574_v24 = vpop.eup %2573 }
  0xe2   :  { %v2576_v27 = vpop.eup %2575 }
  0xe3   :  { %v184_v28 = vadd.f32 1.0, %v2576_v27  ;;  %v2578_v29 = vpop.eup %2577 }
  0xe4   :  { %v183_v30 = vadd.f32 1.0, %v2578_v29 }
  0xe5   :  { %195 = vrot.lane.b32.xlu0 %v2574_v24, %s2795_s27  ;;  %2579 = vrcp.f32 %v184_v28 }
  0xe6   :  { %2581 = vrcp.f32 %v183_v30 }
  0xf2   :  { %v2580_v31 = vpop.eup %2579 }
  0xf3   :  { %v2582_v34 = vpop.eup %2581  ;;  %v192_v37 = vmul.f32 0.0, %v2580_v31 }
  0xf4   :  { %v191_v40 = vmul.f32 0.0, %v2582_v34 }
 0x153   :  { %v198_v32 = vpop.permute.xlu0 %197 }
 0x154   :  { %v202_v33 = vmul.f32 %v2580_v31, %v198_v32 }
 0x156   :  { %207 = vrot.lane.b32.xlu1 %v202_v33, %s2796_s3 }
 0x157   :  { %v196_v35 = vpop.permute.xlu0 %195 }
 0x158   :  { %v201_v36 = vmul.f32 %v2582_v34, %v196_v35 }
 0x15a   :  { %205 = vrot.lane.b32.xlu1 %v201_v36, %s2796_s3 }
 0x1c8   :  { %v208_v38 = vpop.permute.xlu1 %207 }
 0x1c9   :  { %v2909_v39 = vadd.f32 %v208_v38, %v192_v37 }
 0x1cb   :  { %2583 = vtanh.f32 %v2909_v39 }
 0x1cc   :  { %v206_v41 = vpop.permute.xlu1 %205 }
 0x1cd   :  { %v2912_v42 = vadd.f32 %v206_v41, %v191_v40 }
 0x1cf   :  { %2585 = vtanh.f32 %v2912_v42 }
 0x1d8   :  { %v2584_v43 = vpop.eup %2583 }
 0x1d9   :  { %219 = vrot.lane.b32.xlu0 %v2584_v43, %s2795_s27 }
 0x1dc   :  { %v2586_v46 = vpop.eup %2585 }
 0x1dd   :  { %217 = vrot.lane.b32.xlu1 %v2586_v46, %s2795_s27 }
 0x24b   :  { %v220_v49 = vpop.permute.xlu0 %219 }
 0x24c   :  { %v224_v50 = vmul.f32 %v2580_v31, %v220_v49  ;;  %v438_v49 = vrot.slane %v2909_v39, 7 }
 0x24e   :  { %v278_v51 = vpack.c.bf16 %v224_v50, %v224_v50  ;;  %v437_v50 = vrot.slane %v2912_v42, 7 }
 0x24f   :  { %v218_v52 = vpop.permute.xlu1 %217 }
 0x250   :  { %v282_v53 = vunpack.c.l.b16 %v278_v51  ;;  %v223_v54 = vmul.f32 %v2582_v34, %v218_v52 }
 0x252   :  { %v277_v55 = vpack.c.bf16 %v223_v54, %v223_v54  ;;  %v283_v56 = vrot.slane %v282_v53, 7 }
 0x254   :  { %v281_v57 = vunpack.c.l.b16 %v277_v55 }
 0x256   :  { %v285_v58 = vsel %vm284_vm3, %v283_v56, %v281_v57 }
 0x257   :  { %v286_v59 = vpack.c.b16 %v285_v58, %v285_v58 }
 0x259   :  { %287 = vrot.lane.b32.xlu0 %v286_v59, %s2796_s3 }
 0x2cb   :  { %v288_v0 = vpop.permute.xlu0 %287 }
 0x2cc   :  { %2350 = vmatmul.mubr.msk.bf16.vlgmr.msra.gmra.mxu1 %vm127_vm4, %v288_v0  ;;  %2358 = vmatmul.mubr.msk.bf16.vlgmr.msra.gmra.mxu0 %vm127_vm4, %v288_v0 }
 0x2cd   :  { %2362 = vmatpush3.bf16.msra.mxu1 %v2919_v44  ;;  %2365 = vmatprep.mubr.msk.bf16.mxu1 %vm2793_vm1, %v2792_v2 }
 0x2ce   :  { %2363 = vmatprep.subr.bf16.mxu1 %v2792_v2  ;;  %2370 = vmatpush3.bf16.msra.mxu0 %v2933_v47 }
 0x2cf   :  { %2371 = vmatprep.subr.bf16.mxu0 %v2792_v2  ;;  %2373 = vmatprep.mubr.msk.bf16.mxu0 %vm2793_vm1, %v2792_v2 }
 0x2d1   :  { %2364 = vmatpush3.bf16.msra.mxu1 %v2925_v45 }
 0x2d2   :  { %2377 = vmatprep.subr.bf16.mxu1 %v2792_v2  ;;  %2372 = vmatpush3.bf16.msra.mxu0 %v2940_v48 }
 0x2d3   :  { %2385 = vmatprep.subr.bf16.mxu0 %v2792_v2 }
 0x38c   :  { %v338_v3 = vpop.f32.mrf.mxu1  ;;  %v409_v4 = vpop.f32.mrf.mxu0 }
 0x38d   :  { %v339_v6 = vadd.f32 %v338_v3, %v271_v60  ;;  %v416_v8 = vrot.slane %v409_v4, 7  ;;  %v420_v12 = vadd.f32 %v409_v4, %v2899_v15 }
 0x38e   :  { %v2351_v9 = vpop.f32.mrf.mxu1  ;;  %v2359_v10 = vpop.f32.mrf.mxu0 }
 0x38f   :  { %v350_v11 = vadd.f32 %v2966_v1, %v339_v6  ;;  %v419_v16 = vadd.f32 %v416_v8, %v2902_v19  ;;  %v2184_v24 = vmul.f32 -1.442695, %v420_v12 }
 0x390   :  { %v341_v13 = vpop.f32.mrf.mxu1  ;;  %v412_v14 = vpop.f32.mrf.mxu0 }
 0x391   :  { %2587 = vtanh.f32 %v350_v11  ;;  %v2181_v23 = vmul.f32 -1.442695, %v350_v11  ;;  %v2183_v25 = vmul.f32 -1.442695, %v419_v16 }
 0x392   :  { %v2352_v17 = vpop.f32.mrf.mxu1  ;;  %v2360_v18 = vpop.f32.mrf.mxu0  ;;  %2589 = vtanh.f32 %v420_v12 }
 0x393   :  { %2591 = vtanh.f32 %v419_v16 }
 0x394   :  { %2593 = vpow2.f32 %v2181_v23 }
 0x395   :  { %2595 = vpow2.f32 %v2184_v24 }
 0x396   :  { %2597 = vpow2.f32 %v2183_v25 }
 0x39e   :  { %v2588_v20 = vpop.eup %2587 }
 0x39f   :  { %360 = vrot.lane.b32.xlu1 %v2588_v20, %s2795_s27  ;;  %v2590_v21 = vpop.eup %2589 }
 0x3a0   :  { %v2592_v22 = vpop.eup %2591 }
 0x3a1   :  { %445 = vrot.lane.b32.xlu0 %v2592_v22, %s2795_s27  ;;  %v2594_v26 = vpop.eup %2593 }
 0x3a2   :  { %v2596_v27 = vpop.eup %2595  ;;  %v354_v28 = vadd.f32 1.0, %v2594_v26 }
 0x3a3   :  { %447 = vrot.lane.b32.xlu1 %v2590_v21, %s2795_s27  ;;  %v2598_v29 = vpop.eup %2597  ;;  %v428_v30 = vadd.f32 1.0, %v2596_v27 }
 0x3a4   :  { %2599 = vrcp.f32 %v354_v28  ;;  %v427_v31 = vadd.f32 1.0, %v2598_v29 }
 0x3a5   :  { %2601 = vrcp.f32 %v428_v30 }
 0x3a6   :  { %2603 = vrcp.f32 %v427_v31 }
 0x3b1   :  { %v2600_v32 = vpop.eup %2599 }
 0x3b2   :  { %v2602_v35 = vpop.eup %2601  ;;  %v358_v43 = vmul.f32 0.0, %v2600_v32 }
 0x3b3   :  { %v2604_v36 = vpop.eup %2603  ;;  %v442_v53 = vmul.f32 %v2602_v35, %v438_v49 }
 0x3b4   :  { %v441_v52 = vmul.f32 %v2604_v36, %v437_v50 }
 0x411   :  { %v361_v33 = vpop.permute.xlu1 %360 }
 0x412   :  { %v363_v34 = vmul.f32 %v2600_v32, %v361_v33 }
 0x413   :  { %v446_v37 = vpop.permute.xlu0 %445 }
 0x414   :  { %365 = vrot.lane.b32.xlu0 %v363_v34, %s2796_s3  ;;  %v451_v40 = vmul.f32 %v2604_v36, %v446_v37 }
 0x415   :  { %v448_v38 = vpop.permute.xlu1 %447 }
 0x416   :  { %v452_v41 = vmul.f32 %v2602_v35, %v448_v38  ;;  %455 = vrot.lane.b32.xlu1 %v451_v40, %s2796_s3 }
 0x418   :  { %457 = vrot.lane.b32.xlu0 %v452_v41, %s2796_s3 }
 0x486   :  { %v366_v46 = vpop.permute.xlu0 %365 }
 0x487   :  { %v2979_v51 = vadd.f32 %v366_v46, %v358_v43 }
 0x488   :  { %v456_v54 = vpop.permute.xlu1 %455 }
 0x489   :  { %2605 = vtanh.f32 %v2979_v51  ;;  %v2982_v56 = vadd.f32 %v456_v54, %v441_v52 }
 0x48a   :  { %v458_v55 = vpop.permute.xlu0 %457 }
 0x48b   :  { %v2984_v57 = vadd.f32 %v458_v55, %v442_v53  ;;  %2607 = vtanh.f32 %v2982_v56 }
 0x48d   :  { %2609 = vtanh.f32 %v2984_v57 }
 0x496   :  { %v2606_v58 = vpop.eup %2605 }
 0x497   :  { %371 = vrot.lane.b32.xlu1 %v2606_v58, %s2795_s27 }
 0x498   :  { %v2608_v39 = vpop.eup %2607 }
 0x499   :  { %467 = vrot.lane.b32.xlu0 %v2608_v39, %s2795_s27 }
 0x49a   :  { %v2610_v42 = vpop.eup %2609 }
 0x49b   :  { %469 = vrot.lane.b32.xlu1 %v2610_v42, %s2795_s27 }
 0x509   :  { %v372_v59 = vpop.permute.xlu1 %371 }
 0x50a   :  { %v374_v60 = vmul.f32 %v2600_v32, %v372_v59 }
 0x50b   :  { %v468_v62 = vpop.permute.xlu0 %467 }
 0x50c   :  { %v475_v61 = vpack.c.bf16 %v374_v60, %v374_v60  ;;  %v473_v63 = vmul.f32 %v2604_v36, %v468_v62 }
 0x50d   :  { %v470_v0 = vpop.permute.xlu1 %469 }
 0x50e   :  { %477 = vrot.lane.b32.xlu0 %v475_v61, %s2796_s3  ;;  %v474_v3 = vmul.f32 %v2602_v35, %v470_v0  ;;  %v522_v4 = vpack.c.bf16 %v473_v63, %v473_v63  ;;  %v664_v63 = vrot.slane %v2982_v56, 7 }
 0x510   :  { %v523_v6 = vpack.c.bf16 %v474_v3, %v474_v3  ;;  %v526_v8 = vunpack.c.l.b16 %v522_v4 }
 0x512   :  { %v527_v9 = vunpack.c.l.b16 %v523_v6  ;;  %v528_v10 = vrot.slane %v526_v8, 1 }
 0x514   :  { %v529_v11 = vsel %vm284_vm3, %v527_v9, %v528_v10  ;;  %v665_v9 = vrot.slane %v2984_v57, 7 }
 0x515   :  { %v530_v12 = vpack.c.b16 %v529_v11, %v529_v11 }
 0x517   :  { %531 = vrot.lane.b32.xlu1 %v530_v12, %s2796_s3 }
 0x580   :  { %v478_v13 = vpop.permute.xlu0 %477 }
 0x581   :  { %2366 = vmatmul.mubr.msk.bf16.vlgmr.msra.gmra.mxu1 %vm127_vm4, %v478_v13 }
 0x582   :  { %2378 = vmatpush3.bf16.msra.mxu1 %v2873_v5  ;;  %2381 = vmatprep.mubr.msk.bf16.mxu1 %vm2793_vm1, %v2792_v2 }
 0x583   :  { %2379 = vmatprep.subr.bf16.mxu1 %v2792_v2 }
 0x586   :  { %2380 = vmatpush3.bf16.msra.mxu1 %v2880_v7 }
 0x587   :  { %2393 = vmatprep.subr.bf16.mxu1 %v2792_v2 }
 0x589   :  { %v532_v14 = vpop.permute.xlu1 %531 }
 0x58a   :  { %2374 = vmatmul.mubr.msk.bf16.vlgmr.msra.gmra.mxu0 %vm127_vm4, %v532_v14  ;;  %2382 = vmatmul.mubr.msk.bf16.vlgmr.msra.gmra.mxu1 %vm127_vm4, %v532_v14 }
 0x58b   :  { %2386 = vmatpush3.bf16.msra.mxu0 %v2919_v44  ;;  %2389 = vmatprep.mubr.msk.bf16.mxu0 %vm2793_vm1, %v2792_v2 }
 0x58c   :  { %2387 = vmatprep.subr.bf16.mxu0 %v2792_v2  ;;  %2394 = vmatpush3.bf16.msra.mxu1 %v2933_v47 }
 0x58d   :  { %2395 = vmatprep.subr.bf16.mxu1 %v2792_v2  ;;  %2397 = vmatprep.mubr.msk.bf16.mxu1 %vm2793_vm1, %v2792_v2 }
 0x58f   :  { %2388 = vmatpush3.bf16.msra.mxu0 %v2925_v45 }
 0x590   :  { %2401 = vmatprep.subr.bf16.mxu0 %v2792_v2  ;;  %2396 = vmatpush3.bf16.msra.mxu1 %v2940_v48 }
 0x591   :  { %2409 = vmatprep.subr.bf16.mxu1 %v2792_v2 }
 0x641   :  { %v516_v16 = vpop.f32.mrf.mxu1 }
 0x643   :  { %v2367_v17 = vpop.f32.mrf.mxu1 }
 0x645   :  { %v519_v18 = vpop.f32.mrf.mxu1 }
 0x647   :  { %v2368_v20 = vpop.f32.mrf.mxu1 }
 0x64a   :  { %v570_v21 = vpop.f32.mrf.mxu0  ;;  %v635_v22 = vpop.f32.mrf.mxu1 }
 0x64b   :  { %v571_v23 = vadd.f32 %v570_v21, %v516_v16  ;;  %v642_v24 = vrot.slane %v635_v22, 6  ;;  %v643_v25 = vrot.slane %v635_v22, 7 }
 0x64c   :  { %v2375_v26 = vpop.f32.mrf.mxu0  ;;  %v2383_v27 = vpop.f32.mrf.mxu1 }
 0x64d   :  { %v576_v28 = vadd.f32 %v2966_v1, %v571_v23  ;;  %v646_v29 = vadd.f32 %v642_v24, %v2902_v19  ;;  %v647_v32 = vadd.f32 %v643_v25, %v2899_v15 }
 0x64e   :  { %v573_v30 = vpop.f32.mrf.mxu0  ;;  %v638_v31 = vpop.f32.mrf.mxu1 }
 0x64f   :  { %2611 = vtanh.f32 %v576_v28  ;;  %v2187_v38 = vmul.f32 -1.442695, %v576_v28  ;;  %v2189_v40 = vmul.f32 -1.442695, %v646_v29  ;;  %v2190_v41 = vmul.f32 -1.442695, %v647_v32 }
 0x650   :  { %2613 = vtanh.f32 %v646_v29  ;;  %v2376_v33 = vpop.f32.mrf.mxu0  ;;  %v2384_v34 = vpop.f32.mrf.mxu1 }
 0x651   :  { %2615 = vtanh.f32 %v647_v32 }
 0x652   :  { %2617 = vpow2.f32 %v2187_v38 }
 0x653   :  { %2619 = vpow2.f32 %v2189_v40 }
 0x654   :  { %2621 = vpow2.f32 %v2190_v41 }
 0x65c   :  { %v2612_v35 = vpop.eup %2611 }
 0x65d   :  { %v2614_v36 = vpop.eup %2613  ;;  %586 = vrot.lane.b32.xlu0 %v2612_v35, %s2795_s27 }
 0x65e   :  { %672 = vrot.lane.b32.xlu1 %v2614_v36, %s2795_s27  ;;  %v2616_v37 = vpop.eup %2615 }
 0x65f   :  { %v2618_v43 = vpop.eup %2617 }
 0x660   :  { %v2620_v46 = vpop.eup %2619  ;;  %v580_v49 = vadd.f32 1.0, %v2618_v43 }
 0x661   :  { %674 = vrot.lane.b32.xlu0 %v2616_v37, %s2795_s27  ;;  %v654_v50 = vadd.f32 1.0, %v2620_v46  ;;  %v2622_v52 = vpop.eup %2621 }
 0x662   :  { %2623 = vrcp.f32 %v580_v49  ;;  %v655_v53 = vadd.f32 1.0, %v2622_v52 }
 0x663   :  { %2625 = vrcp.f32 %v654_v50 }
 0x664   :  { %2627 = vrcp.f32 %v655_v53 }
 0x66f   :  { %v2624_v54 = vpop.eup %2623 }
 0x670   :  { %v2626_v58 = vpop.eup %2625  ;;  %v584_v0 = vmul.f32 %v2624_v54, %v2979_v51 }
 0x671   :  { %v2628_v60 = vpop.eup %2627  ;;  %v668_v4 = vmul.f32 %v2626_v58, %v664_v63 }
 0x672   :  { %v669_v11 = vmul.f32 %v2628_v60, %v665_v9 }
 0x6cf   :  { %v587_v55 = vpop.permute.xlu0 %586 }
 0x6d0   :  { %v589_v39 = vmul.f32 %v2624_v54, %v587_v55  ;;  %v673_v42 = vpop.permute.xlu1 %672 }
 0x6d1   :  { %v678_v59 = vmul.f32 %v2626_v58, %v673_v42 }
 0x6d2   :  { %591 = vrot.lane.b32.xlu1 %v589_v39, %s2796_s3 }
 0x6d3   :  { %682 = vrot.lane.b32.xlu0 %v678_v59, %s2796_s3  ;;  %v675_v61 = vpop.permute.xlu0 %674 }
 0x6d4   :  { %v679_v62 = vmul.f32 %v2628_v60, %v675_v61 }
 0x6d6   :  { %684 = vrot.lane.b32.xlu1 %v679_v62, %s2796_s3 }
 0x744   :  { %v592_v3 = vpop.permute.xlu1 %591 }
 0x745   :  { %v3026_v6 = vadd.f32 %v592_v3, %v584_v0  ;;  %v683_v8 = vpop.permute.xlu0 %682 }
 0x746   :  { %v3029_v10 = vadd.f32 %v683_v8, %v668_v4 }
 0x747   :  { %2629 = vtanh.f32 %v3026_v6 }
 0x748   :  { %2631 = vtanh.f32 %v3029_v10  ;;  %v685_v12 = vpop.permute.xlu1 %684 }
 0x749   :  { %v3033_v13 = vadd.f32 %v685_v12, %v669_v11 }
 0x74b   :  { %2633 = vtanh.f32 %v3033_v13 }
 0x754   :  { %v2630_v51 = vpop.eup %2629 }
 0x755   :  { %v2632_v56 = vpop.eup %2631  ;;  %597 = vrot.lane.b32.xlu0 %v2630_v51, %s2795_s27 }
 0x756   :  { %694 = vrot.lane.b32.xlu1 %v2632_v56, %s2795_s27 }
 0x758   :  { %v2634_v14 = vpop.eup %2633 }
 0x759   :  { %696 = vrot.lane.b32.xlu0 %v2634_v14, %s2795_s27 }
 0x7c7   :  { %v598_v57 = vpop.permute.xlu0 %597 }
 0x7c8   :  { %v600_v16 = vmul.f32 %v2624_v54, %v598_v57  ;;  %v695_v17 = vpop.permute.xlu1 %694 }
 0x7c9   :  { %v700_v18 = vmul.f32 %v2626_v58, %v695_v17 }
 0x7ca   :  { %v702_v20 = vpack.c.bf16 %v600_v16, %v600_v16 }
 0x7cb   :  { %v749_v21 = vpack.c.bf16 %v700_v18, %v700_v18  ;;  %v697_v22 = vpop.permute.xlu0 %696 }
 0x7cc   :  { %704 = vrot.lane.b32.xlu1 %v702_v20, %s2796_s3  ;;  %v701_v23 = vmul.f32 %v2628_v60, %v697_v22 }
 0x7cd   :  { %v753_v24 = vunpack.c.l.b16 %v749_v21  ;;  %v892_v21 = vrot.slane %v3029_v10, 7 }
 0x7ce   :  { %v750_v25 = vpack.c.bf16 %v701_v23, %v701_v23 }
 0x7cf   :  { %v755_v27 = vrot.slane %v753_v24, 2 }
 0x7d0   :  { %v754_v26 = vunpack.c.l.b16 %v750_v25 }
 0x7d2   :  { %v756_v28 = vrot.slane %v754_v26, 1 }
 0x7d4   :  { %v757_v29 = vsel %vm284_vm3, %v756_v28, %v755_v27  ;;  %v893_v27 = vrot.slane %v3033_v13, 7 }
 0x7d5   :  { %v758_v30 = vpack.c.b16 %v757_v29, %v757_v29 }
 0x7d7   :  { %759 = vrot.lane.b32.xlu0 %v758_v30, %s2796_s3 }
 0x83e   :  { %v705_v31 = vpop.permute.xlu1 %704 }
 0x83f   :  { %2390 = vmatmul.mubr.msk.bf16.vlgmr.msra.gmra.mxu0 %vm127_vm4, %v705_v31 }
 0x840   :  { %2402 = vmatpush3.bf16.msra.mxu0 %v2873_v5  ;;  %2405 = vmatprep.mubr.msk.bf16.mxu0 %vm2793_vm1, %v2792_v2 }
 0x841   :  { %2403 = vmatprep.subr.bf16.mxu0 %v2792_v2 }
 0x844   :  { %2404 = vmatpush3.bf16.msra.mxu0 %v2880_v7 }
 0x845   :  { %2417 = vmatprep.subr.bf16.mxu0 %v2792_v2 }
 0x849   :  { %v760_v32 = vpop.permute.xlu0 %759 }
 0x84a   :  { %2398 = vmatmul.mubr.msk.bf16.vlgmr.msra.gmra.mxu1 %vm127_vm4, %v760_v32  ;;  %2406 = vmatmul.mubr.msk.bf16.vlgmr.msra.gmra.mxu0 %vm127_vm4, %v760_v32 }
 0x84b   :  { %2410 = vmatpush3.bf16.msra.mxu1 %v2919_v44  ;;  %2413 = vmatprep.mubr.msk.bf16.mxu1 %vm2793_vm1, %v2792_v2 }
 0x84c   :  { %2411 = vmatprep.subr.bf16.mxu1 %v2792_v2  ;;  %2418 = vmatpush3.bf16.msra.mxu0 %v2933_v47 }
 0x84d   :  { %2419 = vmatprep.subr.bf16.mxu0 %v2792_v2  ;;  %2421 = vmatprep.mubr.msk.bf16.mxu0 %vm2793_vm1, %v2792_v2 }
 0x84f   :  { %2412 = vmatpush3.bf16.msra.mxu1 %v2925_v45 }
 0x850   :  { %2425 = vmatprep.subr.bf16.mxu1 %v2792_v2  ;;  %2420 = vmatpush3.bf16.msra.mxu0 %v2940_v48 }
 0x851   :  { %2433 = vmatprep.subr.bf16.mxu0 %v2792_v2 }
 0x8ff   :  { %v743_v33 = vpop.f32.mrf.mxu0 }
 0x901   :  { %v2391_v34 = vpop.f32.mrf.mxu0 }
 0x903   :  { %v746_v35 = vpop.f32.mrf.mxu0 }
 0x905   :  { %v2392_v36 = vpop.f32.mrf.mxu0 }
 0x90a   :  { %v798_v37 = vpop.f32.mrf.mxu1  ;;  %v863_v38 = vpop.f32.mrf.mxu0 }
 0x90b   :  { %v799_v40 = vadd.f32 %v798_v37, %v743_v33  ;;  %v870_v41 = vrot.slane %v863_v38, 5  ;;  %v871_v43 = vrot.slane %v863_v38, 6 }
 0x90c   :  { %v2399_v46 = vpop.f32.mrf.mxu1  ;;  %v2407_v49 = vpop.f32.mrf.mxu0 }
 0x90d   :  { %v804_v50 = vadd.f32 %v2966_v1, %v799_v40  ;;  %v874_v52 = vadd.f32 %v870_v41, %v2902_v19  ;;  %v875_v55 = vadd.f32 %v871_v43, %v2899_v15 }
 0x90e   :  { %v801_v53 = vpop.f32.mrf.mxu1  ;;  %v866_v54 = vpop.f32.mrf.mxu0 }
 0x90f   :  { %2635 = vtanh.f32 %v804_v50  ;;  %v2193_v61 = vmul.f32 -1.442695, %v804_v50  ;;  %v2195_v62 = vmul.f32 -1.442695, %v874_v52  ;;  %v2196_v63 = vmul.f32 -1.442695, %v875_v55 }
 0x910   :  { %2637 = vtanh.f32 %v874_v52  ;;  %v2400_v58 = vpop.f32.mrf.mxu1  ;;  %v2408_v39 = vpop.f32.mrf.mxu0 }
 0x911   :  { %2639 = vtanh.f32 %v875_v55 }
 0x912   :  { %2641 = vpow2.f32 %v2193_v61 }
 0x913   :  { %2643 = vpow2.f32 %v2195_v62 }
 0x914   :  { %2645 = vpow2.f32 %v2196_v63 }
 0x91c   :  { %v2636_v42 = vpop.eup %2635 }
 0x91d   :  { %v2638_v59 = vpop.eup %2637  ;;  %814 = vrot.lane.b32.xlu1 %v2636_v42, %s2795_s27 }
 0x91e   :  { %900 = vrot.lane.b32.xlu0 %v2638_v59, %s2795_s27  ;;  %v2640_v60 = vpop.eup %2639 }
 0x91f   :  { %v2642_v0 = vpop.eup %2641 }
 0x920   :  { %v2644_v3 = vpop.eup %2643  ;;  %v808_v4 = vadd.f32 1.0, %v2642_v0 }
 0x921   :  { %902 = vrot.lane.b32.xlu1 %v2640_v60, %s2795_s27  ;;  %v882_v8 = vadd.f32 1.0, %v2644_v3  ;;  %v2646_v9 = vpop.eup %2645 }
 0x922   :  { %2647 = vrcp.f32 %v808_v4  ;;  %v883_v11 = vadd.f32 1.0, %v2646_v9 }
 0x923   :  { %2649 = vrcp.f32 %v882_v8 }
 0x924   :  { %2651 = vrcp.f32 %v883_v11 }
 0x92f   :  { %v2648_v12 = vpop.eup %2647 }
 0x930   :  { %v2650_v56 = vpop.eup %2649  ;;  %v812_v22 = vmul.f32 %v2648_v12, %v3026_v6 }
 0x931   :  { %v2652_v17 = vpop.eup %2651  ;;  %v896_v23 = vmul.f32 %v2650_v56, %v892_v21 }
 0x932   :  { %v897_v29 = vmul.f32 %v2652_v17, %v893_v27 }
 0x98f   :  { %v815_v51 = vpop.permute.xlu1 %814 }
 0x990   :  { %v901_v14 = vpop.permute.xlu0 %900  ;;  %v817_v57 = vmul.f32 %v2648_v12, %v815_v51 }
 0x991   :  { %v906_v16 = vmul.f32 %v2650_v56, %v901_v14 }
 0x992   :  { %819 = vrot.lane.b32.xlu0 %v817_v57, %s2796_s3 }
 0x993   :  { %910 = vrot.lane.b32.xlu1 %v906_v16, %s2796_s3  ;;  %v903_v18 = vpop.permute.xlu1 %902 }
 0x994   :  { %v907_v20 = vmul.f32 %v2652_v17, %v903_v18 }
 0x996   :  { %912 = vrot.lane.b32.xlu0 %v907_v20, %s2796_s3 }
 0xa04   :  { %v820_v24 = vpop.permute.xlu0 %819 }
 0xa05   :  { %v911_v25 = vpop.permute.xlu1 %910  ;;  %v3074_v26 = vadd.f32 %v820_v24, %v812_v22 }
 0xa06   :  { %v3077_v28 = vadd.f32 %v911_v25, %v896_v23 }
 0xa07   :  { %2653 = vtanh.f32 %v3074_v26 }
 0xa08   :  { %2655 = vtanh.f32 %v3077_v28  ;;  %v913_v30 = vpop.permute.xlu0 %912 }
 0xa09   :  { %v3081_v31 = vadd.f32 %v913_v30, %v897_v29 }
 0xa0b   :  { %2657 = vtanh.f32 %v3081_v31 }
 0xa14   :  { %v2654_v6 = vpop.eup %2653 }
 0xa15   :  { %v2656_v10 = vpop.eup %2655  ;;  %825 = vrot.lane.b32.xlu1 %v2654_v6, %s2795_s27 }
 0xa16   :  { %922 = vrot.lane.b32.xlu0 %v2656_v10, %s2795_s27 }
 0xa18   :  { %v2658_v32 = vpop.eup %2657 }
 0xa19   :  { %924 = vrot.lane.b32.xlu1 %v2658_v32, %s2795_s27 }
 0xa87   :  { %v826_v13 = vpop.permute.xlu1 %825 }
 0xa88   :  { %v923_v33 = vpop.permute.xlu0 %922  ;;  %v828_v34 = vmul.f32 %v2648_v12, %v826_v13 }
 0xa89   :  { %v928_v35 = vmul.f32 %v2650_v56, %v923_v33 }
 0xa8a   :  { %v930_v36 = vpack.c.bf16 %v828_v34, %v828_v34 }
 0xa8b   :  { %v977_v37 = vpack.c.bf16 %v928_v35, %v928_v35  ;;  %v925_v38 = vpop.permute.xlu1 %924  ;;  %v1120_v35 = vrot.slane %v3077_v28, 7 }
 0xa8c   :  { %932 = vrot.lane.b32.xlu0 %v930_v36, %s2796_s3  ;;  %v929_v40 = vmul.f32 %v2652_v17, %v925_v38 }
 0xa8d   :  { %v981_v41 = vunpack.c.l.b16 %v977_v37 }
 0xa8e   :  { %v978_v43 = vpack.c.bf16 %v929_v40, %v929_v40 }
 0xa8f   :  { %v983_v49 = vrot.slane %v981_v41, 3 }
 0xa90   :  { %v982_v46 = vunpack.c.l.b16 %v978_v43  ;;  %v1121_v43 = vrot.slane %v3081_v31, 7 }
 0xa92   :  { %v984_v50 = vrot.slane %v982_v46, 2 }
 0xa94   :  { %v985_v52 = vsel %vm284_vm3, %v984_v50, %v983_v49 }
 0xa95   :  { %v986_v53 = vpack.c.b16 %v985_v52, %v985_v52 }
 0xa97   :  { %987 = vrot.lane.b32.xlu1 %v986_v53, %s2796_s3 }
 0xafe   :  { %v933_v54 = vpop.permute.xlu0 %932 }
 0xaff   :  { %2414 = vmatmul.mubr.msk.bf16.vlgmr.msra.gmra.mxu1 %vm127_vm4, %v933_v54 }
 0xb00   :  { %2426 = vmatpush3.bf16.msra.mxu1 %v2873_v5  ;;  %2429 = vmatprep.mubr.msk.bf16.mxu1 %vm2793_vm1, %v2792_v2 }
 0xb01   :  { %2427 = vmatprep.subr.bf16.mxu1 %v2792_v2 }
 0xb04   :  { %2428 = vmatpush3.bf16.msra.mxu1 %v2880_v7 }
 0xb05   :  { %2441 = vmatprep.subr.bf16.mxu1 %v2792_v2 }
 0xb09   :  { %v988_v55 = vpop.permute.xlu1 %987 }
 0xb0a   :  { %2422 = vmatmul.mubr.msk.bf16.vlgmr.msra.gmra.mxu0 %vm127_vm4, %v988_v55  ;;  %2430 = vmatmul.mubr.msk.bf16.vlgmr.msra.gmra.mxu1 %vm127_vm4, %v988_v55 }
 0xb0b   :  { %2434 = vmatpush3.bf16.msra.mxu0 %v2919_v44  ;;  %2437 = vmatprep.mubr.msk.bf16.mxu0 %vm2793_vm1, %v2792_v2 }
 0xb0c   :  { %2435 = vmatprep.subr.bf16.mxu0 %v2792_v2  ;;  %2442 = vmatpush3.bf16.msra.mxu1 %v2933_v47 }
 0xb0d   :  { %2443 = vmatprep.subr.bf16.mxu1 %v2792_v2  ;;  %2445 = vmatprep.mubr.msk.bf16.mxu1 %vm2793_vm1, %v2792_v2 }
 0xb0f   :  { %2436 = vmatpush3.bf16.msra.mxu0 %v2925_v45 }
 0xb10   :  { %2449 = vmatprep.subr.bf16.mxu0 %v2792_v2  ;;  %2444 = vmatpush3.bf16.msra.mxu1 %v2940_v48 }
 0xb11   :  { %2457 = vmatprep.subr.bf16.mxu1 %v2792_v2 }
 0xbbf   :  { %v971_v5 = vpop.f32.mrf.mxu1 }
 0xbc1   :  { %v2415_v7 = vpop.f32.mrf.mxu1 }
 0xbc3   :  { %v974_v58 = vpop.f32.mrf.mxu1 }
 0xbc5   :  { %v2416_v39 = vpop.f32.mrf.mxu1 }
 0xbca   :  { %v1026_v42 = vpop.f32.mrf.mxu0  ;;  %v1091_v59 = vpop.f32.mrf.mxu1 }
 0xbcb   :  { %v1027_v60 = vadd.f32 %v1026_v42, %v971_v5  ;;  %v1098_v61 = vrot.slane %v1091_v59, 4  ;;  %v1099_v62 = vrot.slane %v1091_v59, 5 }
 0xbcc   :  { %v2423_v63 = vpop.f32.mrf.mxu0  ;;  %v2431_v0 = vpop.f32.mrf.mxu1 }
 0xbcd   :  { %v1032_v3 = vadd.f32 %v2966_v1, %v1027_v60  ;;  %v1102_v4 = vadd.f32 %v1098_v61, %v2902_v19  ;;  %v1103_v11 = vadd.f32 %v1099_v62, %v2899_v15 }
 0xbce   :  { %v1029_v8 = vpop.f32.mrf.mxu0  ;;  %v1094_v9 = vpop.f32.mrf.mxu1 }
 0xbcf   :  { %2659 = vtanh.f32 %v1032_v3  ;;  %v2199_v16 = vmul.f32 -1.442695, %v1032_v3  ;;  %v2201_v17 = vmul.f32 -1.442695, %v1102_v4  ;;  %v2202_v18 = vmul.f32 -1.442695, %v1103_v11 }
 0xbd0   :  { %2661 = vtanh.f32 %v1102_v4  ;;  %v2424_v12 = vpop.f32.mrf.mxu0  ;;  %v2432_v51 = vpop.f32.mrf.mxu1  ;;  %v3142_v8 = vld [vmem:[%s3369_s2 + $0x8] sm:$0xff]   ;;  %v3151_v9 = vld [vmem:[%s3369_s2] sm:$0xff]  }
 0xbd1   :  { %2663 = vtanh.f32 %v1103_v11 }
 0xbd2   :  { %2665 = vpow2.f32 %v2199_v16 }
 0xbd3   :  { %2667 = vpow2.f32 %v2201_v17 }
 0xbd4   :  { %2669 = vpow2.f32 %v2202_v18 }
 0xbdc   :  { %v2660_v56 = vpop.eup %2659 }
 0xbdd   :  { %v2662_v14 = vpop.eup %2661  ;;  %1042 = vrot.lane.b32.xlu0 %v2660_v56, %s2795_s27 }
 0xbde   :  { %1128 = vrot.lane.b32.xlu1 %v2662_v14, %s2795_s27  ;;  %v2664_v57 = vpop.eup %2663 }
 0xbdf   :  { %v2666_v20 = vpop.eup %2665 }
 0xbe0   :  { %v2668_v21 = vpop.eup %2667  ;;  %v1036_v22 = vadd.f32 1.0, %v2666_v20 }
 0xbe1   :  { %1130 = vrot.lane.b32.xlu0 %v2664_v57, %s2795_s27  ;;  %v1110_v23 = vadd.f32 1.0, %v2668_v21  ;;  %v2670_v24 = vpop.eup %2669 }
 0xbe2   :  { %2671 = vrcp.f32 %v1036_v22  ;;  %v1111_v25 = vadd.f32 1.0, %v2670_v24 }
 0xbe3   :  { %2673 = vrcp.f32 %v1110_v23 }
 0xbe4   :  { %2675 = vrcp.f32 %v1111_v25 }
 0xbef   :  { %v2672_v27 = vpop.eup %2671 }
 0xbf0   :  { %v2674_v30 = vpop.eup %2673  ;;  %v1040_v36 = vmul.f32 %v2672_v27, %v3074_v26 }
 0xbf1   :  { %v2676_v13 = vpop.eup %2675  ;;  %v1124_v38 = vmul.f32 %v2674_v30, %v1120_v35 }
 0xbf2   :  { %v1125_v49 = vmul.f32 %v2676_v13, %v1121_v43 }
 0xc4f   :  { %v1043_v29 = vpop.permute.xlu0 %1042 }
 0xc50   :  { %v1045_v6 = vmul.f32 %v2672_v27, %v1043_v29  ;;  %v1129_v10 = vpop.permute.xlu1 %1128 }
 0xc51   :  { %v1134_v32 = vmul.f32 %v2674_v30, %v1129_v10 }
 0xc52   :  { %1047 = vrot.lane.b32.xlu1 %v1045_v6, %s2796_s3 }
 0xc53   :  { %1138 = vrot.lane.b32.xlu0 %v1134_v32, %s2796_s3  ;;  %v1131_v33 = vpop.permute.xlu0 %1130 }
 0xc54   :  { %v1135_v34 = vmul.f32 %v2676_v13, %v1131_v33 }
 0xc56   :  { %1140 = vrot.lane.b32.xlu1 %v1135_v34, %s2796_s3 }
 0xcc4   :  { %v1048_v37 = vpop.permute.xlu1 %1047 }
 0xcc5   :  { %v3122_v40 = vadd.f32 %v1048_v37, %v1040_v36  ;;  %v1139_v41 = vpop.permute.xlu0 %1138 }
 0xcc6   :  { %v3125_v46 = vadd.f32 %v1139_v41, %v1124_v38 }
 0xcc7   :  { %2677 = vtanh.f32 %v3122_v40 }
 0xcc8   :  { %2679 = vtanh.f32 %v3125_v46  ;;  %v1141_v50 = vpop.permute.xlu1 %1140 }
 0xcc9   :  { %v3129_v52 = vadd.f32 %v1141_v50, %v1125_v49 }
 0xccb   :  { %2681 = vtanh.f32 %v3129_v52 }
 0xcd4   :  { %v2678_v26 = vpop.eup %2677 }
 0xcd5   :  { %v2680_v28 = vpop.eup %2679  ;;  %1053 = vrot.lane.b32.xlu0 %v2678_v26, %s2795_s27 }
 0xcd6   :  { %1150 = vrot.lane.b32.xlu1 %v2680_v28, %s2795_s27 }
 0xcd8   :  { %v2682_v53 = vpop.eup %2681 }
 0xcd9   :  { %1152 = vrot.lane.b32.xlu0 %v2682_v53, %s2795_s27 }
 0xd47   :  { %v1054_v31 = vpop.permute.xlu0 %1053 }
 0xd48   :  { %v1056_v54 = vmul.f32 %v2672_v27, %v1054_v31  ;;  %v1151_v55 = vpop.permute.xlu1 %1150  ;;  %v1348_v31 = vrot.slane %v3125_v46, 7 }
 0xd49   :  { %v1156_v5 = vmul.f32 %v2674_v30, %v1151_v55 }
 0xd4a   :  { %v1158_v7 = vpack.c.bf16 %v1056_v54, %v1056_v54 }
 0xd4b   :  { %v1205_v58 = vpack.c.bf16 %v1156_v5, %v1156_v5  ;;  %v1153_v39 = vpop.permute.xlu0 %1152 }
 0xd4c   :  { %1160 = vrot.lane.b32.xlu1 %v1158_v7, %s2796_s3  ;;  %v1157_v42 = vmul.f32 %v2676_v13, %v1153_v39  ;;  %v1349_v39 = vrot.slane %v3129_v52, 7 }
 0xd4d   :  { %v1209_v59 = vunpack.c.l.b16 %v1205_v58 }
 0xd4e   :  { %v1206_v60 = vpack.c.bf16 %v1157_v42, %v1157_v42 }
 0xd4f   :  { %v1211_v62 = vrot.slane %v1209_v59, 4 }
 0xd50   :  { %v1210_v61 = vunpack.c.l.b16 %v1206_v60 }
 0xd52   :  { %v1212_v63 = vrot.slane %v1210_v61, 3 }
 0xd54   :  { %v1213_v0 = vsel %vm284_vm3, %v1212_v63, %v1211_v62 }
 0xd55   :  { %v1214_v3 = vpack.c.b16 %v1213_v0, %v1213_v0 }
 0xd57   :  { %1215 = vrot.lane.b32.xlu0 %v1214_v3, %s2796_s3 }
 0xdbe   :  { %v1161_v4 = vpop.permute.xlu1 %1160 }
 0xdbf   :  { %2438 = vmatmul.mubr.msk.bf16.vlgmr.msra.gmra.mxu0 %vm127_vm4, %v1161_v4 }
 0xdc0   :  { %2450 = vmatpush3.bf16.msra.mxu0 %v3142_v8  ;;  %2453 = vmatprep.mubr.msk.bf16.mxu0 %vm2793_vm1, %v2792_v2 }
 0xdc1   :  { %2451 = vmatprep.subr.bf16.mxu0 %v2792_v2 }
 0xdc4   :  { %2452 = vmatpush3.bf16.msra.mxu0 %v3151_v9 }
 0xdc5   :  { %2465 = vmatprep.subr.bf16.mxu0 %v2792_v2 }
 0xdc9   :  { %v1216_v11 = vpop.permute.xlu0 %1215 }
 0xdca   :  { %2446 = vmatmul.mubr.msk.bf16.vlgmr.msra.gmra.mxu1 %vm127_vm4, %v1216_v11  ;;  %2454 = vmatmul.mubr.msk.bf16.vlgmr.msra.gmra.mxu0 %vm127_vm4, %v1216_v11 }
 0xdcb   :  { %2458 = vmatpush3.bf16.msra.mxu1 %v2919_v44  ;;  %2461 = vmatprep.mubr.msk.bf16.mxu1 %vm2793_vm1, %v2792_v2 }
 0xdcc   :  { %2459 = vmatprep.subr.bf16.mxu1 %v2792_v2  ;;  %2466 = vmatpush3.bf16.msra.mxu0 %v2933_v47 }
 0xdcd   :  { %2467 = vmatprep.subr.bf16.mxu0 %v2792_v2  ;;  %2469 = vmatprep.mubr.msk.bf16.mxu0 %vm2793_vm1, %v2792_v2 }
 0xdcf   :  { %2460 = vmatpush3.bf16.msra.mxu1 %v2925_v45 }
 0xdd0   :  { %2473 = vmatprep.subr.bf16.mxu1 %v2792_v2  ;;  %2468 = vmatpush3.bf16.msra.mxu0 %v2940_v48 }
 0xdd1   :  { %2481 = vmatprep.subr.bf16.mxu0 %v2792_v2 }
 0xe7f   :  { %v1199_v44 = vpop.f32.mrf.mxu0 }
 0xe81   :  { %v2439_v12 = vpop.f32.mrf.mxu0 }
 0xe83   :  { %v1202_v51 = vpop.f32.mrf.mxu0 }
 0xe85   :  { %v2440_v56 = vpop.f32.mrf.mxu0 }
 0xe8a   :  { %v1254_v14 = vpop.f32.mrf.mxu1  ;;  %v1319_v57 = vpop.f32.mrf.mxu0 }
 0xe8b   :  { %v1255_v47 = vadd.f32 %v1254_v14, %v1199_v44  ;;  %v1326_v16 = vrot.slane %v1319_v57, 3  ;;  %v1327_v17 = vrot.slane %v1319_v57, 4 }
 0xe8c   :  { %v2447_v18 = vpop.f32.mrf.mxu1  ;;  %v2455_v20 = vpop.f32.mrf.mxu0 }
 0xe8d   :  { %v1260_v21 = vadd.f32 %v2966_v1, %v1255_v47  ;;  %v1330_v45 = vadd.f32 %v1326_v16, %v2902_v19  ;;  %v1331_v48 = vadd.f32 %v1327_v17, %v2899_v15 }
 0xe8e   :  { %v1257_v22 = vpop.f32.mrf.mxu1  ;;  %v1322_v23 = vpop.f32.mrf.mxu0 }
 0xe8f   :  { %2683 = vtanh.f32 %v1260_v21  ;;  %v2205_v1 = vmul.f32 -1.442695, %v1260_v21  ;;  %v2207_v6 = vmul.f32 -1.442695, %v1330_v45  ;;  %v2208_v10 = vmul.f32 -1.442695, %v1331_v48 }
 0xe90   :  { %2685 = vtanh.f32 %v1330_v45  ;;  %v2448_v24 = vpop.f32.mrf.mxu1  ;;  %v2456_v25 = vpop.f32.mrf.mxu0  ;;  %v3208_v21 = vld [vmem:[%s3372_s5 + $0x8] sm:$0xff]   ;;  %v3226_v22 = vld [vmem:[%s3372_s5] sm:$0xff]   ;;  %s2161_s5 = sshll.u32 %s2797_s28, 4  ;;  %s2162_s5 = int_to_ptr.vmem [resolvable:$true] %s2161_s5 }
 0xe91   :  { %2687 = vtanh.f32 %v1331_v48  ;;  %v3217_v45 = vld [vmem:[%s3371_s4 + $0x8] sm:$0xff]   ;;  %v3233_v23 = vld [vmem:[%s3371_s4] sm:$0xff]   ;;  %p2775_p1 = scmp.lt.s32.totalorder %s2162_s5, %s2162_s5 }
 0xe92   :  { %2689 = vpow2.f32 %v2205_v1 }
 0xe93   :  { %2691 = vpow2.f32 %v2207_v6 }
 0xe94   :  { %2693 = vpow2.f32 %v2208_v10 }
 0xe9c   :  { %v2684_v27 = vpop.eup %2683 }
 0xe9d   :  { %v2686_v29 = vpop.eup %2685  ;;  %1270 = vrot.lane.b32.xlu1 %v2684_v27, %s2795_s27 }
 0xe9e   :  { %1356 = vrot.lane.b32.xlu0 %v2686_v29, %s2795_s27  ;;  %v2688_v30 = vpop.eup %2687 }
 0xe9f   :  { %v2690_v32 = vpop.eup %2689 }
 0xea0   :  { %v2692_v13 = vpop.eup %2691  ;;  %v1264_v33 = vadd.f32 1.0, %v2690_v32 }
 0xea1   :  { %1358 = vrot.lane.b32.xlu1 %v2688_v30, %s2795_s27  ;;  %v1338_v34 = vadd.f32 1.0, %v2692_v13  ;;  %v2694_v35 = vpop.eup %2693 }
 0xea2   :  { %2695 = vrcp.f32 %v1264_v33  ;;  %v1339_v36 = vadd.f32 1.0, %v2694_v35  ;;  %v3240_v33 = vld [vmem:[%s3373_s6] ss:$0 sm:$0xff] }
 0xea3   :  { %2697 = vrcp.f32 %v1338_v34 }
 0xea4   :  { %2699 = vrcp.f32 %v1339_v36 }
 0xeaf   :  { %v2696_v37 = vpop.eup %2695 }
 0xeb0   :  { %v2698_v41 = vpop.eup %2697  ;;  %v1268_v54 = vmul.f32 %v2696_v37, %v3122_v40 }
 0xeb1   :  { %v2700_v26 = vpop.eup %2699  ;;  %v1352_v55 = vmul.f32 %v2698_v41, %v1348_v31 }
 0xeb2   :  { %v1353_v59 = vmul.f32 %v2700_v26, %v1349_v39 }
 0xf0f   :  { %v1271_v38 = vpop.permute.xlu1 %1270 }
 0xf10   :  { %v1357_v43 = vpop.permute.xlu0 %1356  ;;  %v1273_v49 = vmul.f32 %v2696_v37, %v1271_v38 }
 0xf11   :  { %v1362_v50 = vmul.f32 %v2698_v41, %v1357_v43 }
 0xf12   :  { %1275 = vrot.lane.b32.xlu0 %v1273_v49, %s2796_s3 }
 0xf13   :  { %1366 = vrot.lane.b32.xlu1 %v1362_v50, %s2796_s3  ;;  %v1359_v28 = vpop.permute.xlu1 %1358 }
 0xf14   :  { %v1363_v53 = vmul.f32 %v2700_v26, %v1359_v28 }
 0xf16   :  { %1368 = vrot.lane.b32.xlu0 %v1363_v53, %s2796_s3 }
 0xf84   :  { %v1276_v5 = vpop.permute.xlu0 %1275 }
 0xf85   :  { %v1367_v7 = vpop.permute.xlu1 %1366  ;;  %v3180_v58 = vadd.f32 %v1276_v5, %v1268_v54 }
 0xf86   :  { %v3183_v42 = vadd.f32 %v1367_v7, %v1352_v55 }
 0xf87   :  { %2701 = vtanh.f32 %v3180_v58 }
 0xf88   :  { %2703 = vtanh.f32 %v3183_v42  ;;  %v1369_v60 = vpop.permute.xlu0 %1368 }
 0xf89   :  { %v3187_v61 = vadd.f32 %v1369_v60, %v1353_v59 }
 0xf8b   :  { %2705 = vtanh.f32 %v3187_v61 }
 0xf94   :  { %v2702_v40 = vpop.eup %2701 }
 0xf95   :  { %v2704_v46 = vpop.eup %2703  ;;  %1281 = vrot.lane.b32.xlu1 %v2702_v40, %s2795_s27 }
 0xf96   :  { %1378 = vrot.lane.b32.xlu0 %v2704_v46, %s2795_s27 }
 0xf98   :  { %v2706_v62 = vpop.eup %2705 }
 0xf99   :  { %1380 = vrot.lane.b32.xlu1 %v2706_v62, %s2795_s27 }
0x1007   :  { %v1282_v52 = vpop.permute.xlu1 %1281 }
0x1008   :  { %v1379_v63 = vpop.permute.xlu0 %1378  ;;  %v1284_v0 = vmul.f32 %v2696_v37, %v1282_v52 }
0x1009   :  { %v1384_v3 = vmul.f32 %v2698_v41, %v1379_v63 }
0x100a   :  { %v1386_v4 = vpack.c.bf16 %v1284_v0, %v1284_v0 }
0x100b   :  { %v1433_v11 = vpack.c.bf16 %v1384_v3, %v1384_v3  ;;  %v1381_v44 = vpop.permute.xlu1 %1380 }
0x100c   :  { %1388 = vrot.lane.b32.xlu0 %v1386_v4, %s2796_s3  ;;  %v1385_v12 = vmul.f32 %v2700_v26, %v1381_v44 }
0x100d   :  { %v1437_v51 = vunpack.c.l.b16 %v1433_v11  ;;  %v1576_v11 = vrot.slane %v3183_v42, 7 }
0x100e   :  { %v1434_v56 = vpack.c.bf16 %v1385_v12, %v1385_v12 }
0x100f   :  { %v1439_v57 = vrot.slane %v1437_v51, 5 }
0x1010   :  { %v1438_v14 = vunpack.c.l.b16 %v1434_v56 }
0x1012   :  { %v1440_v47 = vrot.slane %v1438_v14, 4 }
0x1014   :  { %v1441_v16 = vsel %vm284_vm3, %v1440_v47, %v1439_v57  ;;  %v1577_v57 = vrot.slane %v3187_v61, 7 }
0x1015   :  { %v1442_v17 = vpack.c.b16 %v1441_v16, %v1441_v16 }
0x1017   :  { %1443 = vrot.lane.b32.xlu1 %v1442_v17, %s2796_s3 }
0x107e   :  { %v1389_v18 = vpop.permute.xlu0 %1388 }
0x107f   :  { %2462 = vmatmul.mubr.msk.bf16.vlgmr.msra.gmra.mxu1 %vm127_vm4, %v1389_v18 }
0x1080   :  { %2474 = vmatpush3.bf16.msra.mxu1 %v3142_v8  ;;  %2477 = vmatprep.mubr.msk.bf16.mxu1 %vm2793_vm1, %v2792_v2 }
0x1081   :  { %2475 = vmatprep.subr.bf16.mxu1 %v2792_v2 }
0x1084   :  { %2476 = vmatpush3.bf16.msra.mxu1 %v3151_v9 }
0x1085   :  { %2489 = vmatprep.subr.bf16.mxu1 %v2792_v2 }
0x1089   :  { %v1444_v20 = vpop.permute.xlu1 %1443 }
0x108a   :  { %2470 = vmatmul.mubr.msk.bf16.vlgmr.msra.gmra.mxu0 %vm127_vm4, %v1444_v20  ;;  %2478 = vmatmul.mubr.msk.bf16.vlgmr.msra.gmra.mxu1 %vm127_vm4, %v1444_v20 }
0x108b   :  { %2482 = vmatpush3.bf16.msra.mxu0 %v3208_v21  ;;  %2485 = vmatprep.mubr.msk.bf16.mxu0 %vm2793_vm1, %v2792_v2 }
0x108c   :  { %2483 = vmatprep.subr.bf16.mxu0 %v2792_v2  ;;  %2490 = vmatpush3.bf16.msra.mxu1 %v3217_v45 }
0x108d   :  { %2491 = vmatprep.subr.bf16.mxu1 %v2792_v2  ;;  %2493 = vmatprep.mubr.msk.bf16.mxu1 %vm2793_vm1, %v2792_v2 }
0x108f   :  { %2484 = vmatpush3.bf16.msra.mxu0 %v3226_v22 }
0x1090   :  { %2497 = vmatprep.subr.bf16.mxu0 %v2792_v2  ;;  %2492 = vmatpush3.bf16.msra.mxu1 %v3233_v23 }
0x1091   :  { %2505 = vmatprep.subr.bf16.mxu1 %v2792_v2 }
0x113f   :  { %v1427_v48 = vpop.f32.mrf.mxu1 }
0x1141   :  { %v2463_v24 = vpop.f32.mrf.mxu1 }
0x1143   :  { %v1430_v25 = vpop.f32.mrf.mxu1 }
0x1145   :  { %v2464_v27 = vpop.f32.mrf.mxu1 }
0x114a   :  { %v1482_v29 = vpop.f32.mrf.mxu0  ;;  %v1547_v30 = vpop.f32.mrf.mxu1 }
0x114b   :  { %v1483_v1 = vadd.f32 %v1482_v29, %v1427_v48  ;;  %v1554_v6 = vrot.slane %v1547_v30, 2  ;;  %v1555_v10 = vrot.slane %v1547_v30, 3 }
0x114c   :  { %v2471_v32 = vpop.f32.mrf.mxu0  ;;  %v2479_v13 = vpop.f32.mrf.mxu1 }
0x114d   :  { %v1488_v34 = vadd.f32 %v3240_v33, %v1483_v1  ;;  %v1558_v35 = vadd.f32 %v1554_v6, %v2902_v19  ;;  %v1559_v38 = vadd.f32 %v1555_v10, %v2899_v15 }
0x114e   :  { %v1485_v36 = vpop.f32.mrf.mxu0  ;;  %v1550_v37 = vpop.f32.mrf.mxu1 }
0x114f   :  { %2707 = vtanh.f32 %v1488_v34  ;;  %v2211_v28 = vmul.f32 -1.442695, %v1488_v34  ;;  %v2213_v53 = vmul.f32 -1.442695, %v1558_v35  ;;  %v2214_v31 = vmul.f32 -1.442695, %v1559_v38 }
0x1150   :  { %2709 = vtanh.f32 %v1558_v35  ;;  %v2472_v41 = vpop.f32.mrf.mxu0  ;;  %v2480_v43 = vpop.f32.mrf.mxu1 }
0x1151   :  { %2711 = vtanh.f32 %v1559_v38 }
0x1152   :  { %2713 = vpow2.f32 %v2211_v28 }
0x1153   :  { %2715 = vpow2.f32 %v2213_v53 }
0x1154   :  { %2717 = vpow2.f32 %v2214_v31 }
0x115c   :  { %v2708_v49 = vpop.eup %2707 }
0x115d   :  { %v2710_v50 = vpop.eup %2709  ;;  %1498 = vrot.lane.b32.xlu0 %v2708_v49, %s2795_s27 }
0x115e   :  { %1584 = vrot.lane.b32.xlu1 %v2710_v50, %s2795_s27  ;;  %v2712_v26 = vpop.eup %2711 }
0x115f   :  { %v2714_v54 = vpop.eup %2713 }
0x1160   :  { %v2716_v55 = vpop.eup %2715  ;;  %v1492_v5 = vadd.f32 1.0, %v2714_v54 }
0x1161   :  { %1586 = vrot.lane.b32.xlu0 %v2712_v26, %s2795_s27  ;;  %v1566_v7 = vadd.f32 1.0, %v2716_v55  ;;  %v2718_v39 = vpop.eup %2717 }
0x1162   :  { %2719 = vrcp.f32 %v1492_v5  ;;  %v1567_v59 = vadd.f32 1.0, %v2718_v39 }
0x1163   :  { %2721 = vrcp.f32 %v1566_v7 }
0x1164   :  { %2723 = vrcp.f32 %v1567_v59 }
0x116f   :  { %v2720_v60 = vpop.eup %2719 }
0x1170   :  { %v2722_v46 = vpop.eup %2721  ;;  %v1496_v44 = vmul.f32 %v2720_v60, %v3180_v58 }
0x1171   :  { %v2724_v0 = vpop.eup %2723  ;;  %v1580_v51 = vmul.f32 %v2722_v46, %v1576_v11 }
0x1172   :  { %v1581_v16 = vmul.f32 %v2724_v0, %v1577_v57 }
0x11cf   :  { %v1499_v40 = vpop.permute.xlu0 %1498 }
0x11d0   :  { %v1501_v62 = vmul.f32 %v2720_v60, %v1499_v40  ;;  %v1585_v52 = vpop.permute.xlu1 %1584 }
0x11d1   :  { %v1590_v63 = vmul.f32 %v2722_v46, %v1585_v52 }
0x11d2   :  { %1503 = vrot.lane.b32.xlu1 %v1501_v62, %s2796_s3 }
0x11d3   :  { %1594 = vrot.lane.b32.xlu0 %v1590_v63, %s2796_s3  ;;  %v1587_v3 = vpop.permute.xlu0 %1586 }
0x11d4   :  { %v1591_v4 = vmul.f32 %v2724_v0, %v1587_v3 }
0x11d6   :  { %1596 = vrot.lane.b32.xlu1 %v1591_v4, %s2796_s3 }
0x1244   :  { %v1504_v12 = vpop.permute.xlu1 %1503 }
0x1245   :  { %v3253_v56 = vadd.f32 %v1504_v12, %v1496_v44  ;;  %v1595_v14 = vpop.permute.xlu0 %1594 }
0x1246   :  { %v3256_v47 = vadd.f32 %v1595_v14, %v1580_v51 }
0x1247   :  { %2725 = vtanh.f32 %v3253_v56 }
0x1248   :  { %2727 = vtanh.f32 %v3256_v47  ;;  %v1597_v17 = vpop.permute.xlu1 %1596 }
0x1249   :  { %v3260_v18 = vadd.f32 %v1597_v17, %v1581_v16 }
0x124b   :  { %2729 = vtanh.f32 %v3260_v18 }
0x1254   :  { %v2726_v58 = vpop.eup %2725 }
0x1255   :  { %v2728_v42 = vpop.eup %2727  ;;  %1509 = vrot.lane.b32.xlu0 %v2726_v58, %s2795_s27  ;;  %v1804_v58 = vrot.slane %v3256_v47, 7 }
0x1256   :  { %1606 = vrot.lane.b32.xlu1 %v2728_v42, %s2795_s27 }
0x1258   :  { %v2730_v20 = vpop.eup %2729 }
0x1259   :  { %1608 = vrot.lane.b32.xlu0 %v2730_v20, %s2795_s27 }
0x12c7   :  { %v1510_v61 = vpop.permute.xlu0 %1509 }
0x12c8   :  { %v1512_v48 = vmul.f32 %v2720_v60, %v1510_v61  ;;  %v1607_v24 = vpop.permute.xlu1 %1606  ;;  %v1805_v61 = vrot.slane %v3260_v18, 7 }
0x12c9   :  { %v1612_v25 = vmul.f32 %v2722_v46, %v1607_v24 }
0x12ca   :  { %v1614_v27 = vpack.c.bf16 %v1512_v48, %v1512_v48 }
0x12cb   :  { %v1661_v29 = vpack.c.bf16 %v1612_v25, %v1612_v25  ;;  %v1609_v30 = vpop.permute.xlu0 %1608 }
0x12cc   :  { %1616 = vrot.lane.b32.xlu1 %v1614_v27, %s2796_s3  ;;  %v1613_v1 = vmul.f32 %v2724_v0, %v1609_v30 }
0x12cd   :  { %v1665_v6 = vunpack.c.l.b16 %v1661_v29 }
0x12ce   :  { %v1662_v10 = vpack.c.bf16 %v1613_v1, %v1613_v1 }
0x12cf   :  { %v1667_v13 = vrot.slane %v1665_v6, 6 }
0x12d0   :  { %v1666_v32 = vunpack.c.l.b16 %v1662_v10 }
0x12d2   :  { %v1668_v34 = vrot.slane %v1666_v32, 5 }
0x12d4   :  { %v1669_v35 = vsel %vm284_vm3, %v1668_v34, %v1667_v13 }
0x12d5   :  { %v1670_v36 = vpack.c.b16 %v1669_v35, %v1669_v35 }
0x12d7   :  { %1671 = vrot.lane.b32.xlu0 %v1670_v36, %s2796_s3 }
0x133e   :  { %v1617_v37 = vpop.permute.xlu1 %1616 }
0x133f   :  { %2486 = vmatmul.mubr.msk.bf16.vlgmr.msra.gmra.mxu0 %vm127_vm4, %v1617_v37 }
0x1340   :  { %2498 = vmatpush3.bf16.msra.mxu0 %v3142_v8  ;;  %2501 = vmatprep.mubr.msk.bf16.mxu0 %vm2793_vm1, %v2792_v2 }
0x1341   :  { %2499 = vmatprep.subr.bf16.mxu0 %v2792_v2 }
0x1344   :  { %2500 = vmatpush3.bf16.msra.mxu0 %v3151_v9 }
0x1345   :  { %2513 = vmatprep.subr.bf16.mxu0 %v2792_v2 }
0x1349   :  { %v1672_v38 = vpop.permute.xlu0 %1671 }
0x134a   :  { %2494 = vmatmul.mubr.msk.bf16.vlgmr.msra.gmra.mxu1 %vm127_vm4, %v1672_v38  ;;  %2502 = vmatmul.mubr.msk.bf16.vlgmr.msra.gmra.mxu0 %vm127_vm4, %v1672_v38 }
0x134b   :  { %2506 = vmatpush3.bf16.msra.mxu1 %v3208_v21  ;;  %2514 = vmatpush3.bf16.msra.mxu0 %v3217_v45 }
0x134c   :  { %2507 = vmatprep.subr.bf16.mxu1 %v2792_v2  ;;  %2509 = vmatprep.mubr.msk.bf16.mxu1 %vm2793_vm1, %v2792_v2 }
0x134d   :  { %2515 = vmatprep.subr.bf16.mxu0 %v2792_v2  ;;  %2517 = vmatprep.mubr.msk.bf16.mxu0 %vm2793_vm1, %v2792_v2 }
0x134f   :  { %2508 = vmatpush3.bf16.msra.mxu1 %v3226_v22  ;;  %2516 = vmatpush3.bf16.msra.mxu0 %v3233_v23 }
0x1350   :  { %2521 = vmatprep.subr.bf16.mxu1 %v2792_v2  ;;  %2529 = vmatprep.subr.bf16.mxu0 %v2792_v2 }
0x13ff   :  { %v1655_v8 = vpop.f32.mrf.mxu0 }
0x1401   :  { %v2487_v9 = vpop.f32.mrf.mxu0 }
0x1403   :  { %v1658_v21 = vpop.f32.mrf.mxu0 }
0x1405   :  { %v2488_v45 = vpop.f32.mrf.mxu0 }
0x140a   :  { %v1710_v41 = vpop.f32.mrf.mxu1  ;;  %v1775_v43 = vpop.f32.mrf.mxu0 }
0x140b   :  { %v1711_v49 = vadd.f32 %v1710_v41, %v1655_v8  ;;  %v1782_v50 = vrot.slane %v1775_v43, 1  ;;  %v1783_v26 = vrot.slane %v1775_v43, 2 }
0x140c   :  { %v2495_v28 = vpop.f32.mrf.mxu1  ;;  %v2503_v53 = vpop.f32.mrf.mxu0 }
0x140d   :  { %v1786_v31 = vadd.f32 %v1782_v50, %v2902_v19  ;;  %v1716_v23 = vadd.f32 %v3240_v33, %v1711_v49  ;;  %v1787_v55 = vadd.f32 %v1783_v26, %v2899_v15 }
0x140e   :  { %v1713_v22 = vpop.f32.mrf.mxu1  ;;  %v1778_v54 = vpop.f32.mrf.mxu0 }
0x140f   :  { %2731 = vtanh.f32 %v1786_v31  ;;  %v2219_v19 = vmul.f32 -1.442695, %v1786_v31  ;;  %v2217_v40 = vmul.f32 -1.442695, %v1716_v23  ;;  %v2220_v46 = vmul.f32 -1.442695, %v1787_v55 }
0x1410   :  { %v2496_v5 = vpop.f32.mrf.mxu1  ;;  %v2504_v7 = vpop.f32.mrf.mxu0  ;;  %2733 = vtanh.f32 %v1716_v23 }
0x1411   :  { %2735 = vtanh.f32 %v1787_v55 }
0x1412   :  { %2737 = vpow2.f32 %v2219_v19 }
0x1413   :  { %2739 = vpow2.f32 %v2217_v40 }
0x1414   :  { %2741 = vpow2.f32 %v2220_v46 }
0x141c   :  { %v2732_v39 = vpop.eup %2731 }
0x141d   :  { %1812 = vrot.lane.b32.xlu1 %v2732_v39, %s2795_s27  ;;  %v2734_v59 = vpop.eup %2733 }
0x141e   :  { %v2736_v60 = vpop.eup %2735 }
0x141f   :  { %1814 = vrot.lane.b32.xlu0 %v2736_v60, %s2795_s27  ;;  %v2738_v15 = vpop.eup %2737 }
0x1420   :  { %v2740_v62 = vpop.eup %2739  ;;  %v1794_v52 = vadd.f32 1.0, %v2738_v15 }
0x1421   :  { %1726 = vrot.lane.b32.xlu1 %v2734_v59, %s2795_s27  ;;  %v2742_v63 = vpop.eup %2741  ;;  %v1720_v0 = vadd.f32 1.0, %v2740_v62 }
0x1422   :  { %v1795_v3 = vadd.f32 1.0, %v2742_v63  ;;  %2743 = vrcp.f32 %v1794_v52 }
0x1423   :  { %2745 = vrcp.f32 %v1720_v0  ;;  %v2562_v0 = vld [vmem:[%s3374_s7] sm:$0xff]  }
0x1424   :  { %2747 = vrcp.f32 %v1795_v3 }
0x142f   :  { %v2744_v4 = vpop.eup %2743 }
0x1430   :  { %v2746_v12 = vpop.eup %2745  ;;  %v1808_v42 = vmul.f32 %v2744_v4, %v1804_v58  ;;  %v2568_v58 = vld [vmem:[%s3376_s9 + $0x10] sm:$0xff]  }
0x1431   :  { %v2748_v51 = vpop.eup %2747  ;;  %v1724_v25 = vmul.f32 %v2746_v12, %v3253_v56 }
0x1432   :  { %v1809_v24 = vmul.f32 %v2748_v51, %v1805_v61  ;;  %v2570_v61 = vld [vmem:[%s3376_s9] sm:$0xff]  }
0x148f   :  { %v1813_v11 = vpop.permute.xlu1 %1812 }
0x1490   :  { %v1818_v44 = vmul.f32 %v2744_v4, %v1813_v11  ;;  %v2564_v11 = vld [vmem:[%s3376_s9 + $0x30] sm:$0xff]  }
0x1491   :  { %v1815_v14 = vpop.permute.xlu0 %1814 }
0x1492   :  { %1822 = vrot.lane.b32.xlu0 %v1818_v44, %s2796_s3  ;;  %v1819_v16 = vmul.f32 %v2748_v51, %v1815_v14 }
0x1493   :  { %v1727_v57 = vpop.permute.xlu1 %1726 }
0x1494   :  { %v1729_v17 = vmul.f32 %v2746_v12, %v1727_v57  ;;  %1824 = vrot.lane.b32.xlu1 %v1819_v16, %s2796_s3  ;;  %v2566_v57 = vld [vmem:[%s3376_s9 + $0x20] sm:$0xff]  }
0x1496   :  { %1731 = vrot.lane.b32.xlu0 %v1729_v17, %s2796_s3  ;;  %v2567_v17 = vld [vmem:[%s3376_s9 + $0x18] sm:$0xff]  }
0x1504   :  { %v1823_v20 = vpop.permute.xlu0 %1822 }
0x1505   :  { %v1828_v48 = vadd.f32 %v1823_v20, %v1808_v42  ;;  %v2569_v20 = vld [vmem:[%s3376_s9 + $0x8] sm:$0xff]  }
0x1506   :  { %v1825_v27 = vpop.permute.xlu1 %1824 }
0x1507   :  { %2749 = vtanh.f32 %v1828_v48  ;;  %v1829_v30 = vadd.f32 %v1825_v27, %v1809_v24  ;;  %v2224_v48 = vld [vmem:[%s3375_s8] ss:$0 sm:$0xff]  ;;  %s2770_s8 = scalar_lea.vmem %s2162_s5, 32 }
0x1508   :  { %v1732_v29 = vpop.permute.xlu0 %1731  ;;  %p2771_p0 = scmp.ne.s32.totalorder %s2162_s5, %s2770_s8  ;;  %p2776_p2 = scmp.lt.s32.totalorder %s2770_s8, %s2770_s8 }
0x1509   :  { %v1734_v1 = vadd.f32 %v1732_v29, %v1724_v25  ;;  %2751 = vtanh.f32 %v1829_v30 }
0x150a   :  { %p2777_p3 = por %p2776_p2, %p2775_p1 }
0x150b   :  { %2753 = vtanh.f32 %v1734_v1 }
0x150c   :  { %p2778_p4 = pnand %p2777_p3, %p2771_p0 }
0x1514   :  { %v2750_v6 = vpop.eup %2749 }
0x1515   :  { %1834 = vrot.lane.b32.xlu1 %v2750_v6, %s2795_s27 }
0x1516   :  { %v2752_v10 = vpop.eup %2751 }
0x1517   :  { %1836 = vrot.lane.b32.xlu0 %v2752_v10, %s2795_s27 }
0x1518   :  { %v2754_v47 = vpop.eup %2753 }
0x1519   :  { %1737 = vrot.lane.b32.xlu1 %v2754_v47, %s2795_s27 }
0x1587   :  { %v1835_v18 = vpop.permute.xlu1 %1834 }
0x1588   :  { %v1840_v32 = vmul.f32 %v2744_v4, %v1835_v18  ;;  %v2563_v4 = vld [vmem:[%s3376_s9 + $0x38] sm:$0xff]  }
0x1589   :  { %v1837_v34 = vpop.permute.xlu0 %1836 }
0x158a   :  { %v1889_v13 = vpack.c.bf16 %v1840_v32, %v1840_v32  ;;  %v1841_v35 = vmul.f32 %v2748_v51, %v1837_v34 }
0x158b   :  { %v1738_v36 = vpop.permute.xlu1 %1737 }
0x158c   :  { %v1893_v56 = vunpack.c.l.b16 %v1889_v13  ;;  %v1740_v37 = vmul.f32 %v2746_v12, %v1738_v36  ;;  %v1890_v38 = vpack.c.bf16 %v1841_v35, %v1841_v35  ;;  %v2565_v12 = vld [vmem:[%s3376_s9 + $0x28] sm:$0xff]  }
0x158e   :  { %v1842_v8 = vpack.c.bf16 %v1740_v37, %v1740_v37  ;;  %v1895_v9 = vrot.slane %v1893_v56, 7  ;;  %v1894_v21 = vunpack.c.l.b16 %v1890_v38 }
0x1590   :  { %1844 = vrot.lane.b32.xlu0 %v1842_v8, %s2796_s3  ;;  %v1896_v45 = vrot.slane %v1894_v21, 6 }
0x1592   :  { %v1897_v41 = vsel %vm284_vm3, %v1896_v45, %v1895_v9 }
0x1593   :  { %v1898_v43 = vpack.c.b16 %v1897_v41, %v1897_v41 }
0x1595   :  { %1899 = vrot.lane.b32.xlu1 %v1898_v43, %s2796_s3 }
0x1602   :  { %v1845_v49 = vpop.permute.xlu0 %1844 }
0x1603   :  { %2510 = vmatmul.mubr.msk.bf16.vlgmr.msra.gmra.mxu1 %vm127_vm4, %v1845_v49 }
0x1604   :  { %2525 = vmatprep.mubr.msk.bf16.mxu1 %vm2793_vm1, %v2792_v2 }
0x1607   :  { %v1900_v50 = vpop.permute.xlu1 %1899 }
0x1608   :  { %2518 = vmatmul.mubr.msk.bf16.vlgmr.msra.gmra.mxu0 %vm127_vm4, %v1900_v50 }
0x1609   :  { %2545 = vmatprep.mubr.msk.bf16.mxu0 %vm2793_vm1, %v2792_v2  ;;  %2530 = vmatpush3.bf16.msra.mxu0 %v2563_v4 }
0x160a   :  { %2531 = vmatprep.subr.bf16.mxu0 %v2792_v2 }
0x160d   :  { %2532 = vmatpush3.bf16.msra.mxu0 %v2564_v11 }
0x160e   :  { %2533 = vmatprep.subr.bf16.mxu0 %v2792_v2 }
0x1611   :  { %2534 = vmatpush3.bf16.msra.mxu0 %v2565_v12 }
0x1612   :  { %2535 = vmatprep.subr.bf16.mxu0 %v2792_v2 }
0x1615   :  { %2536 = vmatpush3.bf16.msra.mxu0 %v2566_v57 }
0x1616   :  { %2537 = vmatprep.subr.bf16.mxu0 %v2792_v2 }
0x1619   :  { %2538 = vmatpush3.bf16.msra.mxu0 %v2567_v17 }
0x161a   :  { %2539 = vmatprep.subr.bf16.mxu0 %v2792_v2 }
0x161d   :  { %2540 = vmatpush3.bf16.msra.mxu0 %v2568_v58 }
0x161e   :  { %2541 = vmatprep.subr.bf16.mxu0 %v2792_v2 }
0x1621   :  { %2542 = vmatpush3.bf16.msra.mxu0 %v2569_v20 }
0x1622   :  { %2543 = vmatprep.subr.bf16.mxu0 %v2792_v2 }
0x1625   :  { %2544 = vmatpush3.bf16.msra.mxu0 %v2570_v61 }
0x16c3   :  { %v1883_v26 = vpop.f32.mrf.mxu1 }
0x16c5   :  { %v2511_v28 = vpop.f32.mrf.mxu1 }
0x16c7   :  { %v1886_v53 = vpop.f32.mrf.mxu1 }
0x16c8   :  { %v1938_v31 = vpop.f32.mrf.mxu0 }
0x16c9   :  { %v2512_v22 = vpop.f32.mrf.mxu1  ;;  %v1939_v54 = vadd.f32 %v1938_v31, %v1883_v26 }
0x16ca   :  { %v2519_v23 = vpop.f32.mrf.mxu0 }
0x16cb   :  { %v1944_v55 = vadd.f32 %v3240_v33, %v1939_v54  ;;  %v2561_v33 = vld [vmem:[%s3374_s7 + $0x8] sm:$0xff]  }
0x16cc   :  { %v1941_v5 = vpop.f32.mrf.mxu0  ;;  %2522 = vmatpush3.bf16.msra.mxu1 %v2561_v33 }
0x16cd   :  { %2755 = vtanh.f32 %v1944_v55  ;;  %v2223_v59 = vmul.f32 -1.442695, %v1944_v55  ;;  %2523 = vmatprep.subr.bf16.mxu1 %v2792_v2  ;;  %v2228_v2 = vld [vmem:[%s3377_s10] ss:$0 sm:$0xff] }
0x16ce   :  { %v2520_v7 = vpop.f32.mrf.mxu0 }
0x16cf   :  { %2757 = vpow2.f32 %v2223_v59 }
0x16d0   :  { %2524 = vmatpush3.bf16.msra.mxu1 %v2562_v0 }
0x16da   :  { %v2756_v39 = vpop.eup %2755 }
0x16db   :  { %1954 = vrot.lane.b32.xlu0 %v2756_v39, %s2795_s27 }
0x16dc   :  { %v2758_v60 = vpop.eup %2757 }
0x16dd   :  { %v1948_v19 = vadd.f32 1.0, %v2758_v60 }
0x16df   :  { %2759 = vrcp.f32 %v1948_v19 }
0x16ec   :  { %v2760_v40 = vpop.eup %2759 }
0x16ed   :  { %v1952_v62 = vmul.f32 %v2760_v40, %v1734_v1 }
0x174d   :  { %v1955_v46 = vpop.permute.xlu0 %1954 }
0x174e   :  { %v1957_v15 = vmul.f32 %v2760_v40, %v1955_v46 }
0x1750   :  { %1959 = vrot.lane.b32.xlu1 %v1957_v15, %s2796_s3 }
0x17c2   :  { %v1960_v52 = vpop.permute.xlu1 %1959 }
0x17c3   :  { %v1962_v63 = vadd.f32 %v1960_v52, %v1952_v62 }
0x17c5   :  { %2761 = vtanh.f32 %v1962_v63 }
0x17d2   :  { %v2762_v3 = vpop.eup %2761 }
0x17d3   :  { %1965 = vrot.lane.b32.xlu0 %v2762_v3, %s2795_s27 }
0x1845   :  { %v1966_v44 = vpop.permute.xlu0 %1965 }
0x1846   :  { %v1968_v51 = vmul.f32 %v2760_v40, %v1966_v44 }
0x1848   :  { %v1969_v14 = vmax.f32 %v1968_v51, 0.0 }
0x184a   :  { %v1970_v16 = vpack.c.bf16 %v1969_v14, %v1969_v14 }
0x184c   :  { %1983 = vrot.lane.b32.xlu1 %v1970_v16, %s2796_s3 }
0x18be   :  { %v1984_v42 = vpop.permute.xlu1 %1983 }
0x18bf   :  { %2526 = vmatmul.mubr.msk.bf16.vlgmr.msra.gmra.mxu1 %vm127_vm4, %v1984_v42 }
0x197f   :  { %v2034_v24 = vpop.f32.mrf.mxu1 }
0x1980   :  { %v2035_v25 = vadd.f32 %v2224_v48, %v2034_v24 }
0x1981   :  { %v2527_v27 = vpop.f32.mrf.mxu1 }
0x1982   :  { %v2040_v29 = vmax.f32 %v2035_v25, 0.0 }
0x1983   :  { %v2037_v30 = vpop.f32.mrf.mxu1 }
0x1984   :  { %v2041_v1 = vpack.c.bf16 %v2040_v29, %v2040_v29 }
0x1985   :  { %v2528_v6 = vpop.f32.mrf.mxu1 }
0x1986   :  { %2546 = vmatmul.mubr.bf16.vlgmr.msra.gmra.mxu0 %v2041_v1 }
0x1a46   :  { %v2147_v10 = vpop.f32.mrf.mxu0 }
0x1a47   :  { %v2148_v47 = vadd.f32 %v2228_v2, %v2147_v10 }
0x1a48   :  { %v2547_v18 = vpop.f32.mrf.mxu0 }
0x1a49   :  { %2154 = vst.msk [vmem:[#allocation2] sm:$0x3] %vm2153_vm5, %v2148_v47 }
0x1a4a   :  { %v2150_v32 = vpop.f32.mrf.mxu0 }
0x1a4b   :  { %2781 = shalt.err (!%p2778_p4)
}
0x1a4c   :  { %2164 = dma.vmem_to_hbm [thread:$0]  %s2162_s5, 32, %s3378_s11, [#allocation3]   ;;  %v2548_v13 = vpop.f32.mrf.mxu0 }
0x1a4d   :  { %2790 = dma.done.wait [#allocation3], 32  }
0x1a4e   :  { %2791 = vsyncadd [#allocation3], 4294967264 }
0x1a4f   :  { %2168 = vsyncpa [#allocation3], 1 }

</bundles_post_ra>
